<compile_context>
chip_gen: v6e
topology: v6e:2x2x1
jax: 0.10.0
libtpu: 0.0.40
codegen_flags: <defaults>
</compile_context>

<pallas_src>
import functools
import math

import jax
import jax.numpy as jnp
from jax.experimental import pallas as pl
from jax.experimental.pallas import tpu as pltpu

# Keep kernel-traced dots and the XLA reference at the same (full f32) matmul
# precision so the correctness check is apples-to-apples.
jax.config.update("jax_default_matmul_precision", "highest")

RMS_EPS = 1e-8   # RMSNorm eps (x * rsqrt(mean(x^2)+eps) * g)
LN_EPS = 1e-5    # torch.nn.LayerNorm default eps
HIGHEST = jax.lax.Precision.HIGHEST


# ----------------------------------------------------------------------------
# Fused kernel: one grid point per batch element.
#   x:[1,n,dim] ctx:[1,j,dc] mask:[1,1,j]  weights broadcast  ->  o:[1,n,dim]
# ----------------------------------------------------------------------------
def _cross_attn_kernel(x_ref, ctx_ref, mask_ref, ng_ref, lng_ref, lnb_ref,
                       wq_ref, wk_ref, wv_ref, wo_ref, bo_ref, qg_ref, kg_ref,
                       nk_ref, nv_ref, o_ref, *, heads, dim_head, scale):
    d = dim_head
    x = x_ref[0].astype(jnp.float32)            # (n, dim)
    ctx = ctx_ref[0].astype(jnp.float32)        # (j, dc)
    # mask is 1.0 (keep) / 0.0 (drop) -> additive bias 0 / -1e30
    bias = (mask_ref[0] - 1.0) * 1e30           # (1, j)

    # RMSNorm(x) -> to_q
    xn = x * jax.lax.rsqrt(jnp.mean(x * x, axis=-1, keepdims=True) + RMS_EPS)
    xn = xn * ng_ref[...]
    q = jnp.dot(xn, wq_ref[...], preferred_element_type=jnp.float32)      # (n, dim)

    # LayerNorm(context) -> to_kv (k and v computed as separate lane-dense slabs)
    mu = jnp.mean(ctx, axis=-1, keepdims=True)
    var = jnp.mean((ctx - mu) * (ctx - mu), axis=-1, keepdims=True)
    cn = (ctx - mu) * jax.lax.rsqrt(var + LN_EPS) * lng_ref[...] + lnb_ref[...]
    k = jnp.dot(cn, wk_ref[...], preferred_element_type=jnp.float32)      # (j, dim)
    v = jnp.dot(cn, wv_ref[...], preferred_element_type=jnp.float32)      # (j, dim)

    qg = qg_ref[...]                            # (1, d)
    kg = kg_ref[...]                            # (1, d)
    nk_all = nk_ref[...]                        # (1, dim)  null key  (h d)
    nv_all = nv_ref[...]                        # (1, dim)  null value

    outs = []
    for hh in range(heads):                     # static, heads is small
        lo, hi = hh * d, (hh + 1) * d
        qh = q[:, lo:hi]                        # (n, d)
        kh = k[:, lo:hi]                        # (j, d)
        vh = v[:, lo:hi]                        # (j, d)
        nk = nk_all[:, lo:hi]                   # (1, d)
        nv = nv_all[:, lo:hi]                   # (1, d)

        # q_norm / k_norm (RMSNorm over dim_head); null k is normalized too
        # (the module concatenates nk before applying k_norm).
        qn = qh * jax.lax.rsqrt(jnp.mean(qh * qh, -1, keepdims=True) + RMS_EPS) * qg
        kn = kh * jax.lax.rsqrt(jnp.mean(kh * kh, -1, keepdims=True) + RMS_EPS) * kg
        nkn = nk * jax.lax.rsqrt(jnp.mean(nk * nk, -1, keepdims=True) + RMS_EPS) * kg

        # scores: contract last dim of q against last dim of k (no transpose)
        s = jax.lax.dot_general(qn, kn, (((1,), (1,)), ((), ())),
                                preferred_element_type=jnp.float32) * scale + bias  # (n, j)
        s0 = jax.lax.dot_general(qn, nkn, (((1,), (1,)), ((), ())),
                                 preferred_element_type=jnp.float32) * scale        # (n, 1)

        m = jnp.maximum(jnp.max(s, axis=-1, keepdims=True), s0)
        p = jnp.exp(s - m)                                                           # (n, j)
        p0 = jnp.exp(s0 - m)                                                         # (n, 1)
        denom = jnp.sum(p, axis=-1, keepdims=True) + p0
        num = jnp.dot(p, vh, preferred_element_type=jnp.float32) + p0 * nv           # (n, d)
        outs.append(num / denom)                # exact divide (matches reference)

    o = jnp.concatenate(outs, axis=-1)          # (n, dim) — lane-dense output slab

    # to_out (Linear with bias)
    out = jnp.dot(o, wo_ref[...], preferred_element_type=jnp.float32) + bo_ref[...]
    o_ref[0] = out.astype(o_ref.dtype)


def cross_attention_forward(params, x, context, context_mask, *, heads, dim_head):
    B, n, dim = x.shape
    _, j, dc = context.shape

    wk, wv = jnp.split(params["wkv"], 2, axis=-1)                 # (dc, dim) each
    mask_f = context_mask.astype(jnp.float32).reshape(B, 1, j)

    kernel = functools.partial(_cross_attn_kernel, heads=heads, dim_head=dim_head,
                               scale=1.0 / math.sqrt(dim_head))

    return pl.pallas_call(
        kernel,
        out_shape=jax.ShapeDtypeStruct((B, n, dim), jnp.float32),
        grid=(B,),
        in_specs=[
            pl.BlockSpec((1, n, dim), lambda b: (b, 0, 0)),       # x
            pl.BlockSpec((1, j, dc), lambda b: (b, 0, 0)),        # context
            pl.BlockSpec((1, 1, j), lambda b: (b, 0, 0)),         # mask (float)
            pl.BlockSpec((1, dim), lambda b: (0, 0)),             # norm_g
            pl.BlockSpec((1, dc), lambda b: (0, 0)),              # ln_g
            pl.BlockSpec((1, dc), lambda b: (0, 0)),              # ln_b
            pl.BlockSpec((dim, dim), lambda b: (0, 0)),           # wq
            pl.BlockSpec((dc, dim), lambda b: (0, 0)),            # wk
            pl.BlockSpec((dc, dim), lambda b: (0, 0)),            # wv
            pl.BlockSpec((dim, dim), lambda b: (0, 0)),           # wo
            pl.BlockSpec((1, dim), lambda b: (0, 0)),             # bo
            pl.BlockSpec((1, dim_head), lambda b: (0, 0)),        # qg
            pl.BlockSpec((1, dim_head), lambda b: (0, 0)),        # kg
            pl.BlockSpec((1, dim), lambda b: (0, 0)),             # null_k
            pl.BlockSpec((1, dim), lambda b: (0, 0)),             # null_v
        ],
        out_specs=pl.BlockSpec((1, n, dim), lambda b: (b, 0, 0)),
        compiler_params=pltpu.CompilerParams(dimension_semantics=("parallel",)),
    )(x, context, mask_f,
      params["norm_g"].reshape(1, dim),
      params["ln_g"].reshape(1, dc), params["ln_b"].reshape(1, dc),
      params["wq"], wk, wv,
      params["wo"], params["bo"].reshape(1, dim),
      params["qg"].reshape(1, dim_head), params["kg"].reshape(1, dim_head),
      params["null_kv"][0].reshape(1, dim), params["null_kv"][1].reshape(1, dim))


# ----------------------------------------------------------------------------
# Pure-JAX reference (same math, no Pallas) for correctness checking.
# All matmuls at HIGHEST precision to match the full-f32 MXU math in the kernel.
# ----------------------------------------------------------------------------
def reference_forward(params, x, context, context_mask, heads, dim_head):
    B, n, dim = x.shape
    j = context.shape[1]
    h, d = heads, dim_head

    xn = x * jax.lax.rsqrt(jnp.mean(x * x, -1, keepdims=True) + RMS_EPS) * params["norm_g"]
    mu = jnp.mean(context, -1, keepdims=True)
    var = jnp.mean((context - mu) ** 2, -1, keepdims=True)
    cn = (context - mu) * jax.lax.rsqrt(var + LN_EPS) * params["ln_g"] + params["ln_b"]

    q = jnp.dot(xn, params["wq"], precision=HIGHEST)
    kv = jnp.dot(cn, params["wkv"], precision=HIGHEST)
    k, v = jnp.split(kv, 2, -1)

    qh = q.reshape(B, n, h, d).transpose(0, 2, 1, 3)
    kh = k.reshape(B, j, h, d).transpose(0, 2, 1, 3)
    vh = v.reshape(B, j, h, d).transpose(0, 2, 1, 3)
    nk = jnp.broadcast_to(params["null_kv"][0].reshape(1, h, 1, d), (B, h, 1, d))
    nv = jnp.broadcast_to(params["null_kv"][1].reshape(1, h, 1, d), (B, h, 1, d))
    kh = jnp.concatenate([nk, kh], 2)
    vh = jnp.concatenate([nv, vh], 2)

    qh = qh * jax.lax.rsqrt(jnp.mean(qh * qh, -1, keepdims=True) + RMS_EPS) * params["qg"]
    kh = kh * jax.lax.rsqrt(jnp.mean(kh * kh, -1, keepdims=True) + RMS_EPS) * params["kg"]

    mask = jnp.concatenate([jnp.ones((B, 1), dtype=bool), context_mask], 1)
    s = jnp.einsum("bhnd,bhjd->bhnj", qh, kh, precision=HIGHEST) / math.sqrt(d)
    s = jnp.where(mask[:, None, None, :], s, -1e30)
    p = jax.nn.softmax(s, -1)
    o = jnp.einsum("bhnj,bhjd->bhnd", p, vh, precision=HIGHEST)
    o = o.transpose(0, 2, 1, 3).reshape(B, n, dim)
    return jnp.dot(o, params["wo"], precision=HIGHEST) + params["bo"]


def init_params(key, dim, dim_context, dim_head):
    ks = jax.random.split(key, 6)
    # NOTE: nn.Linear stores (out,in); we store (in,out) and matmul from the right.
    # to_out is given a random init (module zero-inits it) so the test is non-trivial.
    return {
        "norm_g": jnp.ones((dim,), jnp.float32),              # RMSNorm(dim) gain
        "ln_g": jnp.ones((dim_context,), jnp.float32),        # LayerNorm(dim_context)
        "ln_b": jnp.zeros((dim_context,), jnp.float32),
        "null_kv": jax.random.normal(ks[0], (2, dim), jnp.float32),
        "wq": jax.random.normal(ks[1], (dim, dim), jnp.float32) / math.sqrt(dim),
        "wkv": jax.random.normal(ks[2], (dim_context, 2 * dim), jnp.float32) / math.sqrt(dim_context),
        "wo": jax.random.normal(ks[3], (dim, dim), jnp.float32) / math.sqrt(dim),
        "bo": jax.random.normal(ks[4], (dim,), jnp.float32) * 0.02,
        "qg": jnp.ones((dim_head,), jnp.float32),             # q_norm = RMSNorm(dim_head)
        "kg": jnp.ones((dim_head,), jnp.float32),             # k_norm = RMSNorm(dim_head)
    }
    # TODO(synk): time_cond / position_aware branches are not constructed in the
    # default config (time_cond_dim=None, position_aware=False) and are omitted.


if __name__ == "__main__":
    dim, dim_context, dim_head = 64, 48, 32
    heads = dim // dim_head
    B, L_audio, L_text = 2, 16, 8

    key = jax.random.PRNGKey(0)
    kp, kx, kc, km = jax.random.split(key, 4)
    params = init_params(kp, dim, dim_context, dim_head)

    x = jax.random.normal(kx, (B, L_audio, dim), jnp.float32)
    context = jax.random.normal(kc, (B, L_text, dim_context), jnp.float32)
    context_mask = jax.random.bernoulli(km, 0.7, (B, L_text))

    # heads / dim_head are static Python ints baked in BEFORE jit.
    fwd = jax.jit(functools.partial(cross_attention_forward,
                                    heads=heads, dim_head=dim_head))
    out = fwd(params, x, context, context_mask)
    out = jax.block_until_ready(out)

    ref = reference_forward(params, x, context, context_mask, heads, dim_head)
    assert out.shape == (B, L_audio, dim)
    err = jnp.max(jnp.abs(out - ref))
    assert jnp.allclose(out, ref, atol=2e-3, rtol=2e-3), f"max abs err {err}"
    print("KERNEL_OK")
</pallas_src>

<mosaic_0001>
module attributes {stable_mosaic.version = 11 : i64} {
  func.func @_cross_attn_kernel(%arg0: i32, %arg1: memref<1x16x64xf32, #tpu.memory_space<vmem>>, %arg2: memref<1x8x48xf32, #tpu.memory_space<vmem>>, %arg3: memref<1x1x8xf32, #tpu.memory_space<vmem>>, %arg4: memref<1x64xf32, #tpu.memory_space<vmem>>, %arg5: memref<1x48xf32, #tpu.memory_space<vmem>>, %arg6: memref<1x48xf32, #tpu.memory_space<vmem>>, %arg7: memref<64x64xf32, #tpu.memory_space<vmem>>, %arg8: memref<48x64xf32, #tpu.memory_space<vmem>>, %arg9: memref<48x64xf32, #tpu.memory_space<vmem>>, %arg10: memref<64x64xf32, #tpu.memory_space<vmem>>, %arg11: memref<1x64xf32, #tpu.memory_space<vmem>>, %arg12: memref<1x32xf32, #tpu.memory_space<vmem>>, %arg13: memref<1x32xf32, #tpu.memory_space<vmem>>, %arg14: memref<1x64xf32, #tpu.memory_space<vmem>>, %arg15: memref<1x64xf32, #tpu.memory_space<vmem>>, %arg16: memref<1x16x64xf32, #tpu.memory_space<vmem>>) attributes {dimension_semantics = [#tpu.dimension_semantics<parallel>], iteration_bounds = array<i64: 2>, scalar_prefetch = 0 : i64, scratch_operands = 0 : i64, tpu.core_type = #tpu.core_type<tc>, window_params = [{transform_indices = @transform_0, window_bounds = array<i64: 1, 16, 64>}, {transform_indices = @transform_1, window_bounds = array<i64: 1, 8, 48>}, {transform_indices = @transform_2, window_bounds = array<i64: 1, 1, 8>}, {pipeline_mode = #tpu.pipeline_mode<synchronous>, transform_indices = @transform_3, window_bounds = array<i64: 1, 64>}, {pipeline_mode = #tpu.pipeline_mode<synchronous>, transform_indices = @transform_4, window_bounds = array<i64: 1, 48>}, {pipeline_mode = #tpu.pipeline_mode<synchronous>, transform_indices = @transform_5, window_bounds = array<i64: 1, 48>}, {pipeline_mode = #tpu.pipeline_mode<synchronous>, transform_indices = @transform_6, window_bounds = array<i64: 64, 64>}, {pipeline_mode = #tpu.pipeline_mode<synchronous>, transform_indices = @transform_7, window_bounds = array<i64: 48, 64>}, {pipeline_mode = #tpu.pipeline_mode<synchronous>, transform_indices = @transform_8, window_bounds = array<i64: 48, 64>}, {pipeline_mode = #tpu.pipeline_mode<synchronous>, transform_indices = @transform_9, window_bounds = array<i64: 64, 64>}, {pipeline_mode = #tpu.pipeline_mode<synchronous>, transform_indices = @transform_10, window_bounds = array<i64: 1, 64>}, {pipeline_mode = #tpu.pipeline_mode<synchronous>, transform_indices = @transform_11, window_bounds = array<i64: 1, 32>}, {pipeline_mode = #tpu.pipeline_mode<synchronous>, transform_indices = @transform_12, window_bounds = array<i64: 1, 32>}, {pipeline_mode = #tpu.pipeline_mode<synchronous>, transform_indices = @transform_13, window_bounds = array<i64: 1, 64>}, {pipeline_mode = #tpu.pipeline_mode<synchronous>, transform_indices = @transform_14, window_bounds = array<i64: 1, 64>}, {transform_indices = @transform_15, window_bounds = array<i64: 1, 16, 64>}]} {
    %c0 = arith.constant 0 : index
    %c0_0 = arith.constant 0 : index
    %c0_1 = arith.constant 0 : index
    %0 = vector.load %arg1[%c0, %c0_0, %c0_1] : memref<1x16x64xf32, #tpu.memory_space<vmem>>, vector<1x16x64xf32>
    %1 = vector.shape_cast %0 : vector<1x16x64xf32> to vector<16x64xf32>
    %c0_2 = arith.constant 0 : index
    %c0_3 = arith.constant 0 : index
    %c0_4 = arith.constant 0 : index
    %2 = vector.load %arg2[%c0_2, %c0_3, %c0_4] : memref<1x8x48xf32, #tpu.memory_space<vmem>>, vector<1x8x48xf32>
    %3 = vector.shape_cast %2 : vector<1x8x48xf32> to vector<8x48xf32>
    %c0_5 = arith.constant 0 : index
    %c0_6 = arith.constant 0 : index
    %c0_7 = arith.constant 0 : index
    %4 = vector.load %arg3[%c0_5, %c0_6, %c0_7] : memref<1x1x8xf32, #tpu.memory_space<vmem>>, vector<1x1x8xf32>
    %5 = vector.shape_cast %4 : vector<1x1x8xf32> to vector<1x8xf32>
    %cst = arith.constant 1.000000e+00 : f32
    %6 = vector.broadcast %cst : f32 to vector<1x8xf32>
    %7 = arith.subf %5, %6 : vector<1x8xf32>
    %cst_8 = arith.constant 1.000000e+30 : f32
    %8 = vector.broadcast %cst_8 : f32 to vector<1x8xf32>
    %9 = arith.mulf %7, %8 : vector<1x8xf32>
    %10 = arith.mulf %1, %1 : vector<16x64xf32>
    %cst_9 = arith.constant dense<0.000000e+00> : vector<16xf32>
    %11 = vector.multi_reduction <add>, %10, %cst_9 [1] : vector<16x64xf32> to vector<16xf32>
    %12 = vector.shape_cast %11 : vector<16xf32> to vector<16x1xf32>
    %cst_10 = arith.constant 6.400000e+01 : f32
    %13 = vector.broadcast %cst_10 : f32 to vector<16x1xf32>
    %14 = arith.divf %12, %13 : vector<16x1xf32>
    %cst_11 = arith.constant 9.99999993E-9 : f32
    %15 = vector.broadcast %cst_11 : f32 to vector<16x1xf32>
    %16 = arith.addf %14, %15 : vector<16x1xf32>
    %17 = math.rsqrt %16 : vector<16x1xf32>
    %18 = vector.broadcast %17 : vector<16x1xf32> to vector<16x64xf32>
    %19 = arith.mulf %1, %18 : vector<16x64xf32>
    %c0_12 = arith.constant 0 : index
    %c0_13 = arith.constant 0 : index
    %20 = vector.load %arg4[%c0_12, %c0_13] : memref<1x64xf32, #tpu.memory_space<vmem>>, vector<1x64xf32>
    %21 = vector.broadcast %20 : vector<1x64xf32> to vector<16x64xf32>
    %22 = arith.mulf %19, %21 : vector<16x64xf32>
    %c0_14 = arith.constant 0 : index
    %c0_15 = arith.constant 0 : index
    %23 = vector.load %arg7[%c0_14, %c0_15] : memref<64x64xf32, #tpu.memory_space<vmem>>, vector<64x64xf32>
    %cst_16 = arith.constant dense<0.000000e+00> : vector<16x64xf32>
    %24 = tpu.matmul %22, %23, %cst_16 {dimension_numbers = #tpu.dot_dimension_numbers<[1], [0], [0], [1], [0, 0, 1, 1], [], []>, precision = #tpu.contract_precision<fp32>} : vector<16x64xf32>, vector<64x64xf32>, vector<16x64xf32> -> vector<16x64xf32>
    %cst_17 = arith.constant dense<0.000000e+00> : vector<8xf32>
    %25 = vector.multi_reduction <add>, %3, %cst_17 [1] : vector<8x48xf32> to vector<8xf32>
    %26 = vector.shape_cast %25 : vector<8xf32> to vector<8x1xf32>
    %cst_18 = arith.constant 4.800000e+01 : f32
    %27 = vector.broadcast %cst_18 : f32 to vector<8x1xf32>
    %28 = arith.divf %26, %27 : vector<8x1xf32>
    %29 = vector.broadcast %28 : vector<8x1xf32> to vector<8x48xf32>
    %30 = arith.subf %3, %29 : vector<8x48xf32>
    %31 = vector.broadcast %28 : vector<8x1xf32> to vector<8x48xf32>
    %32 = arith.subf %3, %31 : vector<8x48xf32>
    %33 = arith.mulf %30, %32 : vector<8x48xf32>
    %cst_19 = arith.constant dense<0.000000e+00> : vector<8xf32>
    %34 = vector.multi_reduction <add>, %33, %cst_19 [1] : vector<8x48xf32> to vector<8xf32>
    %35 = vector.shape_cast %34 : vector<8xf32> to vector<8x1xf32>
    %cst_20 = arith.constant 4.800000e+01 : f32
    %36 = vector.broadcast %cst_20 : f32 to vector<8x1xf32>
    %37 = arith.divf %35, %36 : vector<8x1xf32>
    %38 = vector.broadcast %28 : vector<8x1xf32> to vector<8x48xf32>
    %39 = arith.subf %3, %38 : vector<8x48xf32>
    %cst_21 = arith.constant 9.99999974E-6 : f32
    %40 = vector.broadcast %cst_21 : f32 to vector<8x1xf32>
    %41 = arith.addf %37, %40 : vector<8x1xf32>
    %42 = math.rsqrt %41 : vector<8x1xf32>
    %43 = vector.broadcast %42 : vector<8x1xf32> to vector<8x48xf32>
    %44 = arith.mulf %39, %43 : vector<8x48xf32>
    %c0_22 = arith.constant 0 : index
    %c0_23 = arith.constant 0 : index
    %45 = vector.load %arg5[%c0_22, %c0_23] : memref<1x48xf32, #tpu.memory_space<vmem>>, vector<1x48xf32>
    %46 = vector.broadcast %45 : vector<1x48xf32> to vector<8x48xf32>
    %47 = arith.mulf %44, %46 : vector<8x48xf32>
    %c0_24 = arith.constant 0 : index
    %c0_25 = arith.constant 0 : index
    %48 = vector.load %arg6[%c0_24, %c0_25] : memref<1x48xf32, #tpu.memory_space<vmem>>, vector<1x48xf32>
    %49 = vector.broadcast %48 : vector<1x48xf32> to vector<8x48xf32>
    %50 = arith.addf %47, %49 : vector<8x48xf32>
    %c0_26 = arith.constant 0 : index
    %c0_27 = arith.constant 0 : index
    %51 = vector.load %arg8[%c0_26, %c0_27] : memref<48x64xf32, #tpu.memory_space<vmem>>, vector<48x64xf32>
    %cst_28 = arith.constant dense<0.000000e+00> : vector<8x64xf32>
    %52 = tpu.matmul %50, %51, %cst_28 {dimension_numbers = #tpu.dot_dimension_numbers<[1], [0], [0], [1], [0, 0, 1, 1], [], []>, precision = #tpu.contract_precision<fp32>} : vector<8x48xf32>, vector<48x64xf32>, vector<8x64xf32> -> vector<8x64xf32>
    %c0_29 = arith.constant 0 : index
    %c0_30 = arith.constant 0 : index
    %53 = vector.load %arg9[%c0_29, %c0_30] : memref<48x64xf32, #tpu.memory_space<vmem>>, vector<48x64xf32>
    %cst_31 = arith.constant dense<0.000000e+00> : vector<8x64xf32>
    %54 = tpu.matmul %50, %53, %cst_31 {dimension_numbers = #tpu.dot_dimension_numbers<[1], [0], [0], [1], [0, 0, 1, 1], [], []>, precision = #tpu.contract_precision<fp32>} : vector<8x48xf32>, vector<48x64xf32>, vector<8x64xf32> -> vector<8x64xf32>
    %c0_32 = arith.constant 0 : index
    %c0_33 = arith.constant 0 : index
    %55 = vector.load %arg12[%c0_32, %c0_33] : memref<1x32xf32, #tpu.memory_space<vmem>>, vector<1x32xf32>
    %c0_34 = arith.constant 0 : index
    %c0_35 = arith.constant 0 : index
    %56 = vector.load %arg13[%c0_34, %c0_35] : memref<1x32xf32, #tpu.memory_space<vmem>>, vector<1x32xf32>
    %c0_36 = arith.constant 0 : index
    %c0_37 = arith.constant 0 : index
    %57 = vector.load %arg14[%c0_36, %c0_37] : memref<1x64xf32, #tpu.memory_space<vmem>>, vector<1x64xf32>
    %c0_38 = arith.constant 0 : index
    %c0_39 = arith.constant 0 : index
    %58 = vector.load %arg15[%c0_38, %c0_39] : memref<1x64xf32, #tpu.memory_space<vmem>>, vector<1x64xf32>
    %59 = vector.extract_strided_slice %24 {offsets = [0, 0], sizes = [16, 32], strides = [1, 1]} : vector<16x64xf32> to vector<16x32xf32>
    %60 = vector.extract_strided_slice %52 {offsets = [0, 0], sizes = [8, 32], strides = [1, 1]} : vector<8x64xf32> to vector<8x32xf32>
    %61 = vector.extract_strided_slice %54 {offsets = [0, 0], sizes = [8, 32], strides = [1, 1]} : vector<8x64xf32> to vector<8x32xf32>
    %62 = vector.extract_strided_slice %57 {offsets = [0, 0], sizes = [1, 32], strides = [1, 1]} : vector<1x64xf32> to vector<1x32xf32>
    %63 = vector.extract_strided_slice %58 {offsets = [0, 0], sizes = [1, 32], strides = [1, 1]} : vector<1x64xf32> to vector<1x32xf32>
    %64 = arith.mulf %59, %59 : vector<16x32xf32>
    %cst_40 = arith.constant dense<0.000000e+00> : vector<16xf32>
    %65 = vector.multi_reduction <add>, %64, %cst_40 [1] : vector<16x32xf32> to vector<16xf32>
    %66 = vector.shape_cast %65 : vector<16xf32> to vector<16x1xf32>
    %cst_41 = arith.constant 3.200000e+01 : f32
    %67 = vector.broadcast %cst_41 : f32 to vector<16x1xf32>
    %68 = arith.divf %66, %67 : vector<16x1xf32>
    %cst_42 = arith.constant 9.99999993E-9 : f32
    %69 = vector.broadcast %cst_42 : f32 to vector<16x1xf32>
    %70 = arith.addf %68, %69 : vector<16x1xf32>
    %71 = math.rsqrt %70 : vector<16x1xf32>
    %72 = vector.broadcast %71 : vector<16x1xf32> to vector<16x32xf32>
    %73 = arith.mulf %59, %72 : vector<16x32xf32>
    %74 = vector.broadcast %55 : vector<1x32xf32> to vector<16x32xf32>
    %75 = arith.mulf %73, %74 : vector<16x32xf32>
    %76 = arith.mulf %60, %60 : vector<8x32xf32>
    %cst_43 = arith.constant dense<0.000000e+00> : vector<8xf32>
    %77 = vector.multi_reduction <add>, %76, %cst_43 [1] : vector<8x32xf32> to vector<8xf32>
    %78 = vector.shape_cast %77 : vector<8xf32> to vector<8x1xf32>
    %cst_44 = arith.constant 3.200000e+01 : f32
    %79 = vector.broadcast %cst_44 : f32 to vector<8x1xf32>
    %80 = arith.divf %78, %79 : vector<8x1xf32>
    %cst_45 = arith.constant 9.99999993E-9 : f32
    %81 = vector.broadcast %cst_45 : f32 to vector<8x1xf32>
    %82 = arith.addf %80, %81 : vector<8x1xf32>
    %83 = math.rsqrt %82 : vector<8x1xf32>
    %84 = vector.broadcast %83 : vector<8x1xf32> to vector<8x32xf32>
    %85 = arith.mulf %60, %84 : vector<8x32xf32>
    %86 = vector.broadcast %56 : vector<1x32xf32> to vector<8x32xf32>
    %87 = arith.mulf %85, %86 : vector<8x32xf32>
    %88 = arith.mulf %62, %62 : vector<1x32xf32>
    %cst_46 = arith.constant dense<0.000000e+00> : vector<1xf32>
    %89 = vector.multi_reduction <add>, %88, %cst_46 [1] : vector<1x32xf32> to vector<1xf32>
    %90 = vector.shape_cast %89 : vector<1xf32> to vector<1x1xf32>
    %cst_47 = arith.constant 3.200000e+01 : f32
    %91 = vector.broadcast %cst_47 : f32 to vector<1x1xf32>
    %92 = arith.divf %90, %91 : vector<1x1xf32>
    %cst_48 = arith.constant 9.99999993E-9 : f32
    %93 = vector.broadcast %cst_48 : f32 to vector<1x1xf32>
    %94 = arith.addf %92, %93 : vector<1x1xf32>
    %95 = math.rsqrt %94 : vector<1x1xf32>
    %96 = vector.broadcast %95 : vector<1x1xf32> to vector<1x32xf32>
    %97 = arith.mulf %62, %96 : vector<1x32xf32>
    %98 = arith.mulf %97, %56 : vector<1x32xf32>
    %cst_49 = arith.constant dense<0.000000e+00> : vector<16x8xf32>
    %99 = tpu.matmul %75, %87, %cst_49 {dimension_numbers = #tpu.dot_dimension_numbers<[1], [1], [0], [0], [0, 0, 1, 0], [], []>, precision = #tpu.contract_precision<fp32>} : vector<16x32xf32>, vector<8x32xf32>, vector<16x8xf32> -> vector<16x8xf32>
    %cst_50 = arith.constant 0.176776692 : f32
    %100 = vector.broadcast %cst_50 : f32 to vector<16x8xf32>
    %101 = arith.mulf %99, %100 : vector<16x8xf32>
    %102 = vector.broadcast %9 : vector<1x8xf32> to vector<16x8xf32>
    %103 = arith.addf %101, %102 : vector<16x8xf32>
    %cst_51 = arith.constant dense<0.000000e+00> : vector<16x1xf32>
    %104 = tpu.matmul %75, %98, %cst_51 {dimension_numbers = #tpu.dot_dimension_numbers<[1], [1], [0], [0], [0, 0, 1, 0], [], []>, precision = #tpu.contract_precision<fp32>} : vector<16x32xf32>, vector<1x32xf32>, vector<16x1xf32> -> vector<16x1xf32>
    %cst_52 = arith.constant 0.176776692 : f32
    %105 = vector.broadcast %cst_52 : f32 to vector<16x1xf32>
    %106 = arith.mulf %104, %105 : vector<16x1xf32>
    %cst_53 = arith.constant dense<0xFF800000> : vector<16xf32>
    %107 = vector.multi_reduction <maximumf>, %103, %cst_53 [1] : vector<16x8xf32> to vector<16xf32>
    %108 = vector.shape_cast %107 : vector<16xf32> to vector<16x1xf32>
    %109 = arith.maximumf %108, %106 : vector<16x1xf32>
    %110 = vector.broadcast %109 : vector<16x1xf32> to vector<16x8xf32>
    %111 = arith.subf %103, %110 : vector<16x8xf32>
    %112 = math.exp %111 : vector<16x8xf32>
    %113 = arith.subf %106, %109 : vector<16x1xf32>
    %114 = math.exp %113 : vector<16x1xf32>
    %cst_54 = arith.constant dense<0.000000e+00> : vector<16xf32>
    %115 = vector.multi_reduction <add>, %112, %cst_54 [1] : vector<16x8xf32> to vector<16xf32>
    %116 = vector.shape_cast %115 : vector<16xf32> to vector<16x1xf32>
    %117 = arith.addf %116, %114 : vector<16x1xf32>
    %cst_55 = arith.constant dense<0.000000e+00> : vector<16x32xf32>
    %118 = tpu.matmul %112, %61, %cst_55 {dimension_numbers = #tpu.dot_dimension_numbers<[1], [0], [0], [1], [0, 0, 1, 1], [], []>, precision = #tpu.contract_precision<fp32>} : vector<16x8xf32>, vector<8x32xf32>, vector<16x32xf32> -> vector<16x32xf32>
    %119 = vector.broadcast %114 : vector<16x1xf32> to vector<16x32xf32>
    %120 = vector.broadcast %63 : vector<1x32xf32> to vector<16x32xf32>
    %121 = arith.mulf %119, %120 : vector<16x32xf32>
    %122 = arith.addf %118, %121 : vector<16x32xf32>
    %123 = vector.broadcast %117 : vector<16x1xf32> to vector<16x32xf32>
    %124 = arith.divf %122, %123 : vector<16x32xf32>
    %125 = vector.extract_strided_slice %24 {offsets = [0, 32], sizes = [16, 32], strides = [1, 1]} : vector<16x64xf32> to vector<16x32xf32>
    %126 = vector.extract_strided_slice %52 {offsets = [0, 32], sizes = [8, 32], strides = [1, 1]} : vector<8x64xf32> to vector<8x32xf32>
    %127 = vector.extract_strided_slice %54 {offsets = [0, 32], sizes = [8, 32], strides = [1, 1]} : vector<8x64xf32> to vector<8x32xf32>
    %128 = vector.extract_strided_slice %57 {offsets = [0, 32], sizes = [1, 32], strides = [1, 1]} : vector<1x64xf32> to vector<1x32xf32>
    %129 = vector.extract_strided_slice %58 {offsets = [0, 32], sizes = [1, 32], strides = [1, 1]} : vector<1x64xf32> to vector<1x32xf32>
    %130 = arith.mulf %125, %125 : vector<16x32xf32>
    %cst_56 = arith.constant dense<0.000000e+00> : vector<16xf32>
    %131 = vector.multi_reduction <add>, %130, %cst_56 [1] : vector<16x32xf32> to vector<16xf32>
    %132 = vector.shape_cast %131 : vector<16xf32> to vector<16x1xf32>
    %cst_57 = arith.constant 3.200000e+01 : f32
    %133 = vector.broadcast %cst_57 : f32 to vector<16x1xf32>
    %134 = arith.divf %132, %133 : vector<16x1xf32>
    %cst_58 = arith.constant 9.99999993E-9 : f32
    %135 = vector.broadcast %cst_58 : f32 to vector<16x1xf32>
    %136 = arith.addf %134, %135 : vector<16x1xf32>
    %137 = math.rsqrt %136 : vector<16x1xf32>
    %138 = vector.broadcast %137 : vector<16x1xf32> to vector<16x32xf32>
    %139 = arith.mulf %125, %138 : vector<16x32xf32>
    %140 = vector.broadcast %55 : vector<1x32xf32> to vector<16x32xf32>
    %141 = arith.mulf %139, %140 : vector<16x32xf32>
    %142 = arith.mulf %126, %126 : vector<8x32xf32>
    %cst_59 = arith.constant dense<0.000000e+00> : vector<8xf32>
    %143 = vector.multi_reduction <add>, %142, %cst_59 [1] : vector<8x32xf32> to vector<8xf32>
    %144 = vector.shape_cast %143 : vector<8xf32> to vector<8x1xf32>
    %cst_60 = arith.constant 3.200000e+01 : f32
    %145 = vector.broadcast %cst_60 : f32 to vector<8x1xf32>
    %146 = arith.divf %144, %145 : vector<8x1xf32>
    %cst_61 = arith.constant 9.99999993E-9 : f32
    %147 = vector.broadcast %cst_61 : f32 to vector<8x1xf32>
    %148 = arith.addf %146, %147 : vector<8x1xf32>
    %149 = math.rsqrt %148 : vector<8x1xf32>
    %150 = vector.broadcast %149 : vector<8x1xf32> to vector<8x32xf32>
    %151 = arith.mulf %126, %150 : vector<8x32xf32>
    %152 = vector.broadcast %56 : vector<1x32xf32> to vector<8x32xf32>
    %153 = arith.mulf %151, %152 : vector<8x32xf32>
    %154 = arith.mulf %128, %128 : vector<1x32xf32>
    %cst_62 = arith.constant dense<0.000000e+00> : vector<1xf32>
    %155 = vector.multi_reduction <add>, %154, %cst_62 [1] : vector<1x32xf32> to vector<1xf32>
    %156 = vector.shape_cast %155 : vector<1xf32> to vector<1x1xf32>
    %cst_63 = arith.constant 3.200000e+01 : f32
    %157 = vector.broadcast %cst_63 : f32 to vector<1x1xf32>
    %158 = arith.divf %156, %157 : vector<1x1xf32>
    %cst_64 = arith.constant 9.99999993E-9 : f32
    %159 = vector.broadcast %cst_64 : f32 to vector<1x1xf32>
    %160 = arith.addf %158, %159 : vector<1x1xf32>
    %161 = math.rsqrt %160 : vector<1x1xf32>
    %162 = vector.broadcast %161 : vector<1x1xf32> to vector<1x32xf32>
    %163 = arith.mulf %128, %162 : vector<1x32xf32>
    %164 = arith.mulf %163, %56 : vector<1x32xf32>
    %cst_65 = arith.constant dense<0.000000e+00> : vector<16x8xf32>
    %165 = tpu.matmul %141, %153, %cst_65 {dimension_numbers = #tpu.dot_dimension_numbers<[1], [1], [0], [0], [0, 0, 1, 0], [], []>, precision = #tpu.contract_precision<fp32>} : vector<16x32xf32>, vector<8x32xf32>, vector<16x8xf32> -> vector<16x8xf32>
    %cst_66 = arith.constant 0.176776692 : f32
    %166 = vector.broadcast %cst_66 : f32 to vector<16x8xf32>
    %167 = arith.mulf %165, %166 : vector<16x8xf32>
    %168 = vector.broadcast %9 : vector<1x8xf32> to vector<16x8xf32>
    %169 = arith.addf %167, %168 : vector<16x8xf32>
    %cst_67 = arith.constant dense<0.000000e+00> : vector<16x1xf32>
    %170 = tpu.matmul %141, %164, %cst_67 {dimension_numbers = #tpu.dot_dimension_numbers<[1], [1], [0], [0], [0, 0, 1, 0], [], []>, precision = #tpu.contract_precision<fp32>} : vector<16x32xf32>, vector<1x32xf32>, vector<16x1xf32> -> vector<16x1xf32>
    %cst_68 = arith.constant 0.176776692 : f32
    %171 = vector.broadcast %cst_68 : f32 to vector<16x1xf32>
    %172 = arith.mulf %170, %171 : vector<16x1xf32>
    %cst_69 = arith.constant dense<0xFF800000> : vector<16xf32>
    %173 = vector.multi_reduction <maximumf>, %169, %cst_69 [1] : vector<16x8xf32> to vector<16xf32>
    %174 = vector.shape_cast %173 : vector<16xf32> to vector<16x1xf32>
    %175 = arith.maximumf %174, %172 : vector<16x1xf32>
    %176 = vector.broadcast %175 : vector<16x1xf32> to vector<16x8xf32>
    %177 = arith.subf %169, %176 : vector<16x8xf32>
    %178 = math.exp %177 : vector<16x8xf32>
    %179 = arith.subf %172, %175 : vector<16x1xf32>
    %180 = math.exp %179 : vector<16x1xf32>
    %cst_70 = arith.constant dense<0.000000e+00> : vector<16xf32>
    %181 = vector.multi_reduction <add>, %178, %cst_70 [1] : vector<16x8xf32> to vector<16xf32>
    %182 = vector.shape_cast %181 : vector<16xf32> to vector<16x1xf32>
    %183 = arith.addf %182, %180 : vector<16x1xf32>
    %cst_71 = arith.constant dense<0.000000e+00> : vector<16x32xf32>
    %184 = tpu.matmul %178, %127, %cst_71 {dimension_numbers = #tpu.dot_dimension_numbers<[1], [0], [0], [1], [0, 0, 1, 1], [], []>, precision = #tpu.contract_precision<fp32>} : vector<16x8xf32>, vector<8x32xf32>, vector<16x32xf32> -> vector<16x32xf32>
    %185 = vector.broadcast %180 : vector<16x1xf32> to vector<16x32xf32>
    %186 = vector.broadcast %129 : vector<1x32xf32> to vector<16x32xf32>
    %187 = arith.mulf %185, %186 : vector<16x32xf32>
    %188 = arith.addf %184, %187 : vector<16x32xf32>
    %189 = vector.broadcast %183 : vector<16x1xf32> to vector<16x32xf32>
    %190 = arith.divf %188, %189 : vector<16x32xf32>
    %191 = tpu.concatenate %124, %190 in 1 : vector<16x32xf32>, vector<16x32xf32> -> vector<16x64xf32>
    %c0_72 = arith.constant 0 : index
    %c0_73 = arith.constant 0 : index
    %192 = vector.load %arg10[%c0_72, %c0_73] : memref<64x64xf32, #tpu.memory_space<vmem>>, vector<64x64xf32>
    %cst_74 = arith.constant dense<0.000000e+00> : vector<16x64xf32>
    %193 = tpu.matmul %191, %192, %cst_74 {dimension_numbers = #tpu.dot_dimension_numbers<[1], [0], [0], [1], [0, 0, 1, 1], [], []>, precision = #tpu.contract_precision<fp32>} : vector<16x64xf32>, vector<64x64xf32>, vector<16x64xf32> -> vector<16x64xf32>
    %c0_75 = arith.constant 0 : index
    %c0_76 = arith.constant 0 : index
    %194 = vector.load %arg11[%c0_75, %c0_76] : memref<1x64xf32, #tpu.memory_space<vmem>>, vector<1x64xf32>
    %195 = vector.broadcast %194 : vector<1x64xf32> to vector<16x64xf32>
    %196 = arith.addf %193, %195 : vector<16x64xf32>
    %c0_77 = arith.constant 0 : index
    %c0_78 = arith.constant 0 : index
    %c0_79 = arith.constant 0 : index
    %197 = vector.load %arg16[%c0_77, %c0_78, %c0_79] : memref<1x16x64xf32, #tpu.memory_space<vmem>>, vector<1x16x64xf32>
    %198 = vector.shape_cast %197 : vector<1x16x64xf32> to vector<16x64xf32>
    %199 = vector.shape_cast %196 : vector<16x64xf32> to vector<1x16x64xf32>
    tpu.vector_store %arg16[%c0_77, %c0_78, %c0_79], %199 {strides = array<i32>} : memref<1x16x64xf32, #tpu.memory_space<vmem>>, vector<1x16x64xf32>,
    return
  }
  func.func @transform_0(%arg0: i32) -> (i32, i32, i32) {
    %c0_i32 = arith.constant 0 : i32
    %c0_i32_0 = arith.constant 0 : i32
    %c0_i32_1 = arith.constant 0 : i32
    return %arg0, %c0_i32, %c0_i32_0 : i32, i32, i32
  }
  func.func @transform_1(%arg0: i32) -> (i32, i32, i32) {
    %c0_i32 = arith.constant 0 : i32
    %c0_i32_0 = arith.constant 0 : i32
    %c0_i32_1 = arith.constant 0 : i32
    return %arg0, %c0_i32, %c0_i32_0 : i32, i32, i32
  }
  func.func @transform_2(%arg0: i32) -> (i32, i32, i32) {
    %c0_i32 = arith.constant 0 : i32
    %c0_i32_0 = arith.constant 0 : i32
    %c0_i32_1 = arith.constant 0 : i32
    return %arg0, %c0_i32, %c0_i32_0 : i32, i32, i32
  }
  func.func @transform_3(%arg0: i32) -> (i32, i32) {
    %c0_i32 = arith.constant 0 : i32
    %c0_i32_0 = arith.constant 0 : i32
    %c0_i32_1 = arith.constant 0 : i32
    return %c0_i32, %c0_i32_0 : i32, i32
  }
  func.func @transform_4(%arg0: i32) -> (i32, i32) {
    %c0_i32 = arith.constant 0 : i32
    %c0_i32_0 = arith.constant 0 : i32
    %c0_i32_1 = arith.constant 0 : i32
    return %c0_i32, %c0_i32_0 : i32, i32
  }
  func.func @transform_5(%arg0: i32) -> (i32, i32) {
    %c0_i32 = arith.constant 0 : i32
    %c0_i32_0 = arith.constant 0 : i32
    %c0_i32_1 = arith.constant 0 : i32
    return %c0_i32, %c0_i32_0 : i32, i32
  }
  func.func @transform_6(%arg0: i32) -> (i32, i32) {
    %c0_i32 = arith.constant 0 : i32
    %c0_i32_0 = arith.constant 0 : i32
    %c0_i32_1 = arith.constant 0 : i32
    return %c0_i32, %c0_i32_0 : i32, i32
  }
  func.func @transform_7(%arg0: i32) -> (i32, i32) {
    %c0_i32 = arith.constant 0 : i32
    %c0_i32_0 = arith.constant 0 : i32
    %c0_i32_1 = arith.constant 0 : i32
    return %c0_i32, %c0_i32_0 : i32, i32
  }
  func.func @transform_8(%arg0: i32) -> (i32, i32) {
    %c0_i32 = arith.constant 0 : i32
    %c0_i32_0 = arith.constant 0 : i32
    %c0_i32_1 = arith.constant 0 : i32
    return %c0_i32, %c0_i32_0 : i32, i32
  }
  func.func @transform_9(%arg0: i32) -> (i32, i32) {
    %c0_i32 = arith.constant 0 : i32
    %c0_i32_0 = arith.constant 0 : i32
    %c0_i32_1 = arith.constant 0 : i32
    return %c0_i32, %c0_i32_0 : i32, i32
  }
  func.func @transform_10(%arg0: i32) -> (i32, i32) {
    %c0_i32 = arith.constant 0 : i32
    %c0_i32_0 = arith.constant 0 : i32
    %c0_i32_1 = arith.constant 0 : i32
    return %c0_i32, %c0_i32_0 : i32, i32
  }
  func.func @transform_11(%arg0: i32) -> (i32, i32) {
    %c0_i32 = arith.constant 0 : i32
    %c0_i32_0 = arith.constant 0 : i32
    %c0_i32_1 = arith.constant 0 : i32
    return %c0_i32, %c0_i32_0 : i32, i32
  }
  func.func @transform_12(%arg0: i32) -> (i32, i32) {
    %c0_i32 = arith.constant 0 : i32
    %c0_i32_0 = arith.constant 0 : i32
    %c0_i32_1 = arith.constant 0 : i32
    return %c0_i32, %c0_i32_0 : i32, i32
  }
  func.func @transform_13(%arg0: i32) -> (i32, i32) {
    %c0_i32 = arith.constant 0 : i32
    %c0_i32_0 = arith.constant 0 : i32
    %c0_i32_1 = arith.constant 0 : i32
    return %c0_i32, %c0_i32_0 : i32, i32
  }
  func.func @transform_14(%arg0: i32) -> (i32, i32) {
    %c0_i32 = arith.constant 0 : i32
    %c0_i32_0 = arith.constant 0 : i32
    %c0_i32_1 = arith.constant 0 : i32
    return %c0_i32, %c0_i32_0 : i32, i32
  }
  func.func @transform_15(%arg0: i32) -> (i32, i32, i32) {
    %c0_i32 = arith.constant 0 : i32
    %c0_i32_0 = arith.constant 0 : i32
    %c0_i32_1 = arith.constant 0 : i32
    return %arg0, %c0_i32, %c0_i32_0 : i32, i32, i32
  }
}

</mosaic_0001>

<bundles_post_ra>
// kernel: cross_attention_forward.1
= control target key start
LH: loop header
LB: loop body
LE: loop exit
PB: predicated region body
PF: predicated region fallthrough
CT: control target
= control target key end

     0   :  { %s7347_s0 = inlined_call_operand.vmem [shape: f32[2,16,64], index: 0, kind: input, shape index: {}]   ;;  %s7348_s1 = inlined_call_operand.vmem [shape: f32[2,8,48], index: 1, kind: input, shape index: {}]   ;;  %s7349_s2 = inlined_call_operand.vmem [shape: f32[2,1,8], index: 2, kind: input, shape index: {}]   ;;  %s7350_s3 = inlined_call_operand.vmem [shape: f32[1,64], index: 3, kind: input, shape index: {}]   ;;  %s7351_s4 = inlined_call_operand.vmem [shape: f32[1,48], index: 4, kind: input, shape index: {}]   ;;  %s7352_s5 = inlined_call_operand.vmem [shape: f32[1,48], index: 5, kind: input, shape index: {}]   ;;  %s7353_s6 = inlined_call_operand.vmem [shape: f32[64,64], index: 6, kind: input, shape index: {}]   ;;  %s7354_s7 = inlined_call_operand.vmem [shape: f32[48,64], index: 7, kind: input, shape index: {}]   ;;  %s7355_s8 = inlined_call_operand.vmem [shape: f32[48,64], index: 8, kind: input, shape index: {}]   ;;  %s7356_s9 = inlined_call_operand.vmem [shape: f32[64,64], index: 9, kind: input, shape index: {}]   ;;  %s7357_s10 = inlined_call_operand.vmem [shape: f32[1,64], index: 10, kind: input, shape index: {}]   ;;  %s7358_s11 = inlined_call_operand.vmem [shape: f32[1,32], index: 11, kind: input, shape index: {}]   ;;  %s7359_s12 = inlined_call_operand.vmem [shape: f32[1,32], index: 12, kind: input, shape index: {}]   ;;  %s7360_s13 = inlined_call_operand.vmem [shape: f32[1,64], index: 13, kind: input, shape index: {}]   ;;  %s7361_s14 = inlined_call_operand.vmem [shape: f32[1,64], index: 14, kind: input, shape index: {}]   ;;  %s7362_s15 = inlined_call_operand.hbm [shape: f32[2,16,64], index: 15, kind: output, shape index: {}]  }
   0x1   :  { %7366 = sst [smem:[#allocation8_spill]] %s7347_s0 }
   0x2   :  { %7367 = sst [smem:[#allocation9_spill]] %s7348_s1 }
   0x3   :  { %20 = vsyncpa [#allocation3], 0 }
   0x4   :  { %22 = vsyncpa [#allocation3 + $0x1], 0  ;;  %s6244_s18 = smov 0   ;;  %s6246_s19 = smov 0  }
   0x5   :  { %s6248_s20 = smov 0   ;;  %s6250_s21 = smov 0  }
   0x6 LB: > { %7368 = sst [smem:[#allocation5_spill]] %s6151_s20  ;;  %s6265_s22 = sadd.s32 4294967295, %s6155_s21   ;;  %s6155_s21 = sphi %s6250_s21, %s7375_s21   ;;  %s6151_s20 = sphi %s6248_s20, %s7377_s20   ;;  %s6147_s19 = sphi %s6246_s19, %s7379_s19   ;;  %s6143_s18 = sphi %s6244_s18, %s7378_s18  }
   0x7   : > { %s5178_s23 = sadd.s32 4294967294, %s6155_s21   ;;  %s6269_s24 = sadd.s32 1, %s6155_s21  }
   0x8   : > { %7369 = sst [smem:[#allocation6_spill]] %s6269_s24  ;;  %s365_s25 = sadd.s32 1, %s6151_s20 }
   0x9   : > { %s362_s26 = ssub.s32 %s6155_s21, %s6269_s24  ;;  %p375_p0 = scmp.ne.s32.totalorder %s6151_s20, %s6147_s19 }
   0xa   : > { %p363_p1 = scmp.eq.s32.totalorder %s362_s26, 0  ;;  %p376_p2 = scmp.eq.s32.totalorder %s6265_s22, 1 }
   0xb   : > { %p381_p3 = scmp.ne.s32.totalorder %s6147_s19, %s6143_s18  ;;  %p382_p4 = scmp.eq.s32.totalorder %s5178_s23, 1 }
   0xc   : > { %s6280_s27 = scalar_select %p363_p1, %s6151_s20, %s365_s25  }
   0xd   : > { %p6282_p5 = por %p376_p2, %p375_p0  ;;  %p6286_p6 = por %p382_p4, %p381_p3 }
   0xe   : > { %7370 = sst [smem:[#allocation7_spill]] %s6280_s27  ;;  %p5181_p7 = scmp.ge.s32.totalorder %s6155_s21, 1 }
   0xf   : > { %p457_p8 = scmp.lt.s32.totalorder %s6155_s21, 3 }
  0x11   : > { %p458_p9 = pnand %p5181_p7, %p457_p8 }
  0x12   : > { %p512_p10 = scmp.lt.s32.totalorder (!%p458_p9), %s6265_s22, 1  ;;  %s7373_s1 = sld [smem:[#allocation9_spill]] (!%p458_p9) }
  0x13   : > { %461 = sbr.rel (%p458_p9) target bundleno = 2156 (0x86c), region = 80  ;;  %s7374_s0 = sld [smem:[#allocation8_spill]] (!%p458_p9) }
  0x14   : > { %s509_s23 = sand.u32 (!%p458_p9), 1, %s6147_s19  }
  0x18   : > { %s6294_s30 = scalar_select %p512_p10, %s6265_s22, 1  ;;  %vm1151_vm0 = vcmask 392192   ;;  %vm532_vm1 = vcmask 523264   ;;  %v564_v8 = vld [vmem:[%s7353_s6 + $0x38] sm:$0xff]  ;;  %v563_v9 = vld [vmem:[%s7353_s6 + $0x30] sm:$0xff]  ;;  %v562_v10 = vld [vmem:[%s7353_s6 + $0x28] sm:$0xff] }
  0x19   : > { %v6327_v11 = vand.u32 4294901760, %v564_v8  ;;  %v6329_v12 = vand.u32 4294901760, %v563_v9  ;;  %v6331_v13 = vand.u32 4294901760, %v562_v10  ;;  %v561_v14 = vld [vmem:[%s7353_s6 + $0x20] sm:$0xff]  ;;  %v560_v15 = vld [vmem:[%s7353_s6 + $0x18] sm:$0xff]  ;;  %v559_v16 = vld [vmem:[%s7353_s6 + $0x10] sm:$0xff] }
  0x1a   : > { %s5185_s16 = sshll.u32 %s6294_s30, 3  ;;  %s5198_s26 = sshll.u32 %s6294_s30, 4  ;;  %v6342_v17 = vand.u32 4294901760, %v561_v14  ;;  %v6344_v18 = vand.u32 4294901760, %v560_v15  ;;  %v6346_v19 = vand.u32 4294901760, %v559_v16  ;;  %v558_v20 = vld [vmem:[%s7353_s6 + $0x8] sm:$0xff] }
  0x1b   : > { %s520_s25 = scalar_lea.vmem %s7373_s1, %s5185_s16  ;;  %s516_s24 = scalar_lea.vmem %s7374_s0, %s5198_s26  ;;  %5476 = vmatprep.subr.mxu0 %v6327_v11  ;;  %v6353_v21 = vsub.f32 %v564_v8, %v6327_v11  ;;  %v6356_v22 = vsub.f32 %v563_v9, %v6329_v12  ;;  %v6359_v23 = vsub.f32 %v562_v10, %v6331_v13  ;;  %v6361_v24 = vand.u32 4294901760, %v558_v20  ;;  %v557_v44 = vld [vmem:[%s7353_s6] sm:$0xff] }
  0x1c   : > { %v6301_v0 = vld [vmem:[%s520_s25] sm:$0xff]  ;;  %v6310_v3 = vld [vmem:[%s516_s24 + $0x8] sm:$0xff]  ;;  %5477 = vmatpush3.msra.mxu0 %v6327_v11  ;;  %v6365_v25 = vsub.f32 %v561_v14, %v6342_v17  ;;  %v6368_v26 = vsub.f32 %v560_v15, %v6344_v18  ;;  %v6381_v30 = vsub.f32 %v559_v16, %v6346_v19  ;;  %v6423_v48 = vand.u32 4294901760, %v557_v44  ;;  %s6159_s25 = smov 96   ;;  %s523_s27 = scalar_lea.vmem %s7349_s2, %s6294_s30 }
  0x1d   : > { %v1152_v1 = vsel %vm1151_vm0, %v6301_v0, 0.0  ;;  %v6308_v2 = vld [vmem:[%s516_s24] sm:$0xff]  ;;  %v531_v5 = vmul.f32 %v6310_v3, %v6310_v3  ;;  %5478 = vmatprep.subr.mxu0 %v6329_v12  ;;  %v6372_v27 = vand.u32 4294901760, %v6353_v21  ;;  %v6375_v28 = vand.u32 4294901760, %v6356_v22  ;;  %s6160_s24 = smov 32   ;;  %s5182_s26 = sshll.u32 %s509_s23, 4 }
  0x1e   : > { %1153 = vadd.xlane.f32.xlu0 %v1152_v1  ;;  %v530_v4 = vmul.f32 %v6308_v2, %v6308_v2  ;;  %v6378_v29 = vand.u32 4294901760, %v6359_v23  ;;  %5479 = vmatpush3.msra.mxu0 %v6329_v12  ;;  %v6385_v31 = vand.u32 4294901760, %v6365_v25  ;;  %v6388_v32 = vsub.f32 %v558_v20, %v6361_v24  ;;  %s511_s20 = scalar_lea.vmem [#allocation2], %s5182_s26  ;;  %s5199_s30 = sshll.u32 %s6265_s22, 8 }
  0x1f   : > { %v536_v7 = vsel %vm532_vm1, %v531_v5, 0.0  ;;  %v684_v33 = vsub.f32 %v6353_v21, %v6372_v27  ;;  %5480 = vmatprep.subr.mxu0 %v6331_v13  ;;  %v691_v34 = vsub.f32 %v6356_v22, %v6375_v28  ;;  %v6398_v36 = vand.u32 4294901760, %v6368_v26  ;;  %s7307_s22 = scalar_lea.sflag [#allocation3], %s509_s23  ;;  %s6161_s26 = smov [#allocation2]  }
  0x20   : > { %v533_v6 = vsel %vm532_vm1, %v530_v4, 0.0  ;;  %537 = vadd.xlane.f32.xlu1 %v536_v7  ;;  %v698_v35 = vsub.f32 %v6359_v23, %v6378_v29  ;;  %5481 = vmatpush3.msra.mxu0 %v6331_v13  ;;  %v705_v39 = vsub.f32 %v6365_v25, %v6385_v31  ;;  %v6405_v40 = vand.u32 4294901760, %v6381_v30 }
  0x21   : > { %v685_v37 = vand.u32 4294901760, %v684_v33  ;;  %v692_v38 = vand.u32 4294901760, %v691_v34  ;;  %5482 = vmatprep.subr.mxu0 %v6342_v17  ;;  %v712_v42 = vsub.f32 %v6368_v26, %v6398_v36  ;;  %v6412_v43 = vand.u32 4294901760, %v6388_v32 }
  0x22   : > { %534 = vadd.xlane.f32.xlu0 %v533_v6  ;;  %5483 = vmatpush3.msra.mxu0 %v6342_v17  ;;  %v699_v41 = vand.u32 4294901760, %v698_v35  ;;  %v706_v45 = vand.u32 4294901760, %v705_v39  ;;  %v719_v46 = vsub.f32 %v6381_v30, %v6405_v40  ;;  %v6432_v52 = vsub.f32 %v557_v44, %v6423_v48  ;;  %v1182_v44 = vld [vmem:[%s7354_s7] sm:$0xff] }
  0x23   : > { %5495 = vmatprep.subr.mxu1 %v685_v37  ;;  %5484 = vmatprep.subr.mxu0 %v6344_v18  ;;  %v713_v47 = vand.u32 4294901760, %v712_v42  ;;  %v726_v49 = vsub.f32 %v6388_v32, %v6412_v43  ;;  %vm6158_vm2 = vmmov 0   ;;  %vm2225_vm3 = vcmask 261120  }
  0x24   : > { %5496 = vmatpush3.msra.mxu1 %v685_v37  ;;  %5485 = vmatpush3.msra.mxu0 %v6344_v18  ;;  %v720_v50 = vand.u32 4294901760, %v719_v46  ;;  %v6435_v53 = vand.u32 4294901760, %v6432_v52  ;;  %vm2265_vm4 = vcmask 253952   ;;  %vm2798_vm5 = vcmask 64512  }
  0x25   : > { %5497 = vmatprep.subr.mxu1 %v692_v38  ;;  %5486 = vmatprep.subr.mxu0 %v6346_v19  ;;  %v727_v51 = vand.u32 4294901760, %v726_v49 }
  0x26   : > { %5498 = vmatpush3.msra.mxu1 %v692_v38  ;;  %5487 = vmatpush3.msra.mxu0 %v6346_v19  ;;  %v733_v54 = vsub.f32 %v6432_v52, %v6435_v53 }
  0x27   : > { %5499 = vmatprep.subr.mxu1 %v699_v41  ;;  %5488 = vmatprep.subr.mxu0 %v6361_v24 }
  0x28   : > { %5500 = vmatpush3.msra.mxu1 %v699_v41  ;;  %5489 = vmatpush3.msra.mxu0 %v6361_v24  ;;  %v734_v55 = vand.u32 4294901760, %v733_v54  ;;  %v6157_v54 = vmov 0.0  }
  0x29   : > { %5501 = vmatprep.subr.mxu1 %v706_v45  ;;  %5490 = vmatprep.subr.mxu0 %v6423_v48 }
  0x2a   : > { %5502 = vmatpush3.msra.mxu1 %v706_v45  ;;  %5491 = vmatpush3.msra.mxu0 %v6423_v48 }
  0x2b   : > { %5503 = vmatprep.subr.mxu1 %v713_v47  ;;  %5514 = vmatprep.subr.mxu0 %v6353_v21 }
  0x2c   : > { %5504 = vmatpush3.msra.mxu1 %v713_v47  ;;  %v6550_v47 = vand.u32 4294901760, %v1182_v44 }
  0x2d   : > { %5505 = vmatprep.subr.mxu1 %v720_v50 }
  0x2e   : > { %5506 = vmatpush3.msra.mxu1 %v720_v50  ;;  %v6572_v50 = vsub.f32 %v1182_v44, %v6550_v47 }
  0x2f   : > { %5507 = vmatprep.subr.mxu1 %v727_v51 }
  0x30   : > { %5508 = vmatpush3.msra.mxu1 %v727_v51 }
  0x31   : > { %5509 = vmatprep.subr.mxu1 %v734_v55 }
  0x32   : > { %5510 = vmatpush3.msra.mxu1 %v734_v55 }
  0x33   : > { %5533 = vmatprep.subr.mxu1 %v6327_v11 }
  0xa7   : > { %v1154_v56 = vpop.xlane.xlu0 %1153 }
  0xa8   : > { %v1156_v57 = vmul.f32 0.020833334, %v1154_v56 }
  0xa9   : > { %v538_v59 = vpop.xlane.xlu1 %537 }
  0xaa   : > { %v6441_v58 = vsub.f32 %v6301_v0, %v1156_v57  ;;  %v541_v61 = vmul.f32 0.015625, %v538_v59  ;;  %v5187_v0 = vld [vmem:[%s7350_s3] ss:$0 sm:$0xff] }
  0xab   : > { %v535_v60 = vpop.xlane.xlu0 %534 }
  0xac   : > { %v540_v62 = vmul.f32 0.015625, %v535_v60  ;;  %v1158_v63 = vmul.f32 %v6441_v58, %v6441_v58  ;;  %v543_v1 = vadd.f32 1e-08, %v541_v61 }
  0xae   : > { %v542_v4 = vadd.f32 1e-08, %v540_v62  ;;  %v1159_v5 = vsel %vm1151_vm0, %v1158_v63, 0.0  ;;  %6049 = vrsqrt.f32 %v543_v1  ;;  %v5188_v1 = vld [vmem:[%s7351_s4] ss:$0 sm:$0xff] }
  0xaf   : > { %1160 = vadd.xlane.f32.xlu1 %v1159_v5  ;;  %v5189_v5 = vld [vmem:[%s7352_s5] ss:$0 sm:$0xff] }
  0xb0   : > { %6051 = vrsqrt.f32 %v542_v4 }
  0xbb   : > { %v6050_v6 = vpop.eup %6049 }
  0xbc   : > { %v547_v8 = vmul.f32 %v6050_v6, %v6310_v3 }
  0xbd   : > { %v6052_v7 = vpop.eup %6051 }
  0xbe   : > { %v546_v9 = vmul.f32 %v6052_v7, %v6308_v2  ;;  %v556_v10 = vmul.f32 %v5187_v0, %v547_v8 }
  0xc0   : > { %v555_v14 = vmul.f32 %v5187_v0, %v546_v9  ;;  %v569_v15 = vsel %vm532_vm1, %v556_v10, 0 }
  0xc1   : > { %v6453_v20 = vand.u32 4294901760, %v569_v15 }
  0xc2   : > { %v566_v16 = vsel %vm532_vm1, %v555_v14, 0  ;;  %v1707_v14 = vld [vmem:[%s7355_s8 + $0x28] sm:$0xff] }
  0xc3   : > { %v6455_v33 = vand.u32 4294901760, %v566_v16  ;;  %v655_v34 = vsub.f32 %v569_v15, %v6453_v20 }
  0xc5   : > { %v645_v35 = vsub.f32 %v566_v16, %v6455_v33  ;;  %5511 = vmatprep.mubr.f32.mxu1 %v6455_v33  ;;  %v656_v37 = vand.u32 4294901760, %v655_v34  ;;  %v1706_v16 = vld [vmem:[%s7355_s8 + $0x20] sm:$0xff] }
  0xc6   : > { %5512 = vmatmul.mubr.f32.vlgmr.msra.gmra.mxu1 %v6453_v20 }
  0xc7   : > { %v646_v2 = vand.u32 4294901760, %v645_v35  ;;  %5534 = vmatpush3.msra.mxu1 %v6327_v11  ;;  %v657_v3 = vsub.f32 %v655_v34, %v656_v37 }
  0xc8   : > { %5535 = vmatprep.subr.mxu1 %v6329_v12 }
  0xc9   : > { %v647_v38 = vsub.f32 %v645_v35, %v646_v2  ;;  %5536 = vmatpush3.msra.mxu1 %v6329_v12  ;;  %5549 = vmatprep.mubr.f32.mxu1 %v646_v2  ;;  %v658_v39 = vand.u32 4294901760, %v657_v3 }
  0xca   : > { %5537 = vmatprep.subr.mxu1 %v6331_v13 }
  0xcb   : > { %v648_v41 = vand.u32 4294901760, %v647_v38  ;;  %5538 = vmatpush3.msra.mxu1 %v6331_v13 }
  0xcc   : > { %5539 = vmatprep.subr.mxu1 %v6342_v17 }
  0xcd   : > { %5492 = vmatprep.mubr.f32.mxu0 %v648_v41  ;;  %5540 = vmatpush3.msra.mxu1 %v6342_v17 }
  0xce   : > { %5493 = vmatmul.mubr.f32.vlgmr.msra.gmra.mxu0 %v658_v39  ;;  %5541 = vmatprep.subr.mxu1 %v6344_v18  ;;  %v1703_v39 = vld [vmem:[%s7355_s8 + $0x8] sm:$0xff] }
  0xcf   : > { %5515 = vmatpush3.msra.mxu0 %v6353_v21  ;;  %5542 = vmatpush3.msra.mxu1 %v6344_v18  ;;  %v1187_v21 = vld [vmem:[%s7354_s7 + $0x28] sm:$0xff] }
  0xd0   : > { %5516 = vmatprep.subr.mxu0 %v6356_v22  ;;  %5543 = vmatprep.subr.mxu1 %v6346_v19 }
  0xd1   : > { %5517 = vmatpush3.msra.mxu0 %v6356_v22  ;;  %5544 = vmatpush3.msra.mxu1 %v6346_v19  ;;  %v1186_v22 = vld [vmem:[%s7354_s7 + $0x20] sm:$0xff] }
  0xd2   : > { %5518 = vmatprep.subr.mxu0 %v6359_v23  ;;  %5545 = vmatprep.subr.mxu1 %v6361_v24 }
  0xd3   : > { %5519 = vmatpush3.msra.mxu0 %v6359_v23  ;;  %5546 = vmatpush3.msra.mxu1 %v6361_v24  ;;  %v6495_v23 = vand.u32 4294901760, %v1187_v21 }
  0xd4   : > { %5520 = vmatprep.subr.mxu0 %v6365_v25  ;;  %5530 = vmatprep.mubr.f32.mxu0 %v645_v35  ;;  %v1704_v35 = vld [vmem:[%s7355_s8 + $0x10] sm:$0xff] }
  0xd5   : > { %5521 = vmatpush3.msra.mxu0 %v6365_v25  ;;  %5547 = vmatprep.subr.mxu1 %v6423_v48  ;;  %v1185_v25 = vld [vmem:[%s7354_s7 + $0x18] sm:$0xff]  ;;  %v6691_v38 = vand.u32 4294901760, %v1704_v35 }
  0xd6   : > { %5522 = vmatprep.subr.mxu0 %v6368_v26  ;;  %5548 = vmatpush3.msra.mxu1 %v6423_v48 }
  0xd7   : > { %5523 = vmatpush3.msra.mxu0 %v6368_v26  ;;  %5571 = vmatprep.subr.mxu1 %v6327_v11  ;;  %v6504_v26 = vand.u32 4294901760, %v1186_v22 }
  0xd8   : > { %5524 = vmatprep.subr.mxu0 %v6381_v30  ;;  %5550 = vmatmul.mubr.f32.vlgmr.msra.gmra.mxu1 %v656_v37 }
  0xd9   : > { %5525 = vmatpush3.msra.mxu0 %v6381_v30  ;;  %5572 = vmatpush3.msra.mxu1 %v6327_v11  ;;  %v1184_v11 = vld [vmem:[%s7354_s7 + $0x10] sm:$0xff]  ;;  %v6514_v30 = vsub.f32 %v1187_v21, %v6495_v23  ;;  %v6525_v42 = vsub.f32 %v1186_v22, %v6504_v26  ;;  %v1702_v22 = vld [vmem:[%s7355_s8] sm:$0xff] }
  0xda   : > { %5526 = vmatprep.subr.mxu0 %v6388_v32  ;;  %5573 = vmatprep.subr.mxu1 %v6329_v12 }
  0xdb   : > { %5527 = vmatpush3.msra.mxu0 %v6388_v32  ;;  %5574 = vmatpush3.msra.mxu1 %v6329_v12  ;;  %v6516_v32 = vand.u32 4294901760, %v1185_v25  ;;  %v1183_v12 = vld [vmem:[%s7354_s7 + $0x8] sm:$0xff] }
  0xdc   : > { %5528 = vmatprep.subr.mxu0 %v6432_v52  ;;  %5575 = vmatprep.subr.mxu1 %v6331_v13  ;;  %v6540_v46 = vand.u32 4294901760, %v1183_v12 }
  0xdd   : > { %5529 = vmatpush3.msra.mxu0 %v6432_v52  ;;  %5576 = vmatpush3.msra.mxu1 %v6331_v13  ;;  %v6527_v13 = vand.u32 4294901760, %v1184_v11  ;;  %v6538_v45 = vsub.f32 %v1185_v25, %v6516_v32 }
  0xde   : > { %5552 = vmatprep.subr.mxu0 %v6372_v27  ;;  %5531 = vmatmul.mubr.f32.vlgmr.msra.gmra.mxu0 %v655_v34  ;;  %v6561_v49 = vsub.f32 %v1183_v12, %v6540_v46  ;;  %v6670_v34 = vand.u32 4294901760, %v1706_v16 }
  0xdf   : > { %5553 = vmatpush3.msra.mxu0 %v6372_v27  ;;  %5577 = vmatprep.subr.mxu1 %v6342_v17  ;;  %v1295_v27 = vand.u32 4294901760, %v6514_v30 }
  0xe0   : > { %5554 = vmatprep.subr.mxu0 %v6375_v28  ;;  %5578 = vmatpush3.msra.mxu1 %v6342_v17  ;;  %v1302_v17 = vand.u32 4294901760, %v6525_v42  ;;  %v1323_v51 = vand.u32 4294901760, %v6561_v49  ;;  %v6689_v3 = vsub.f32 %v1706_v16, %v6670_v34 }
  0xe1   : > { %5555 = vmatpush3.msra.mxu0 %v6375_v28  ;;  %5579 = vmatprep.subr.mxu1 %v6344_v18  ;;  %v6548_v28 = vsub.f32 %v1184_v11, %v6527_v13  ;;  %v6719_v11 = vand.u32 4294901760, %v1702_v22 }
  0xe2   : > { %5556 = vmatprep.subr.mxu0 %v6378_v29  ;;  %5580 = vmatpush3.msra.mxu1 %v6344_v18  ;;  %v1296_v18 = vsub.f32 %v6514_v30, %v1295_v27  ;;  %v1819_v25 = vand.u32 4294901760, %v6689_v3 }
  0xe3   : > { %5557 = vmatpush3.msra.mxu0 %v6378_v29  ;;  %5581 = vmatprep.subr.mxu1 %v6346_v19  ;;  %v1309_v29 = vand.u32 4294901760, %v6538_v45 }
  0xe4   : > { %5558 = vmatprep.subr.mxu0 %v6385_v31  ;;  %5582 = vmatpush3.msra.mxu1 %v6346_v19  ;;  %v1303_v19 = vsub.f32 %v6525_v42, %v1302_v17 }
  0xe5   : > { %5559 = vmatpush3.msra.mxu0 %v6385_v31  ;;  %5583 = vmatprep.subr.mxu1 %v6361_v24  ;;  %v1316_v31 = vand.u32 4294901760, %v6548_v28 }
  0xe6   : > { %5560 = vmatprep.subr.mxu0 %v6398_v36  ;;  %5568 = vmatprep.mubr.f32.mxu0 %v6455_v33  ;;  %v1304_v52 = vand.u32 4294901760, %v1303_v19  ;;  %v6743_v19 = vsub.f32 %v1702_v22, %v6719_v11 }
  0xe7   : > { %5561 = vmatpush3.msra.mxu0 %v6398_v36  ;;  %5584 = vmatpush3.msra.mxu1 %v6361_v24  ;;  %v1297_v36 = vand.u32 4294901760, %v1296_v18  ;;  %v1310_v24 = vsub.f32 %v6538_v45, %v1309_v29 }
  0xe8   : > { %5562 = vmatprep.subr.mxu0 %v6405_v40  ;;  %5585 = vmatprep.subr.mxu1 %v6423_v48 }
  0xe9   : > { %5563 = vmatpush3.msra.mxu0 %v6405_v40  ;;  %5586 = vmatpush3.msra.mxu1 %v6423_v48  ;;  %v1317_v40 = vsub.f32 %v6548_v28, %v1316_v31  ;;  %v1330_v48 = vand.u32 4294901760, %v6572_v50  ;;  %v1311_v55 = vand.u32 4294901760, %v1310_v24 }
  0xea   : > { %5564 = vmatprep.subr.mxu0 %v6412_v43  ;;  %5587 = vmatprep.mubr.f32.mxu1 %v6455_v33  ;;  %v1705_v33 = vld [vmem:[%s7355_s8 + $0x18] sm:$0xff] }
  0xeb   : > { %5565 = vmatpush3.msra.mxu0 %v6412_v43  ;;  %5588 = vmatmul.mubr.f32.vlgmr.msra.gmra.mxu1 %v6453_v20  ;;  %v1324_v43 = vsub.f32 %v6561_v49, %v1323_v51  ;;  %v1318_v56 = vand.u32 4294901760, %v1317_v40  ;;  %v1331_v57 = vsub.f32 %v6572_v50, %v1330_v48  ;;  %v6682_v2 = vand.u32 4294901760, %v1705_v33 }
  0xec   : > { %5566 = vmatprep.subr.mxu0 %v6435_v53  ;;  %5605 = vmatprep.subr.mxu1 %v6157_v54 }
  0xed   : > { %5567 = vmatpush3.msra.mxu0 %v6435_v53  ;;  %5606 = vmatpush3.msra.mxu1 %v1297_v36  ;;  %v1325_v53 = vand.u32 4294901760, %v1324_v43  ;;  %v1332_v59 = vand.u32 4294901760, %v1331_v57  ;;  %v6702_v21 = vsub.f32 %v1705_v33, %v6682_v2 }
  0xee   : > { %5569 = vmatmul.mubr.f32.vlgmr.msra.gmra.mxu0 %v6453_v20  ;;  %5607 = vmatprep.subr.mxu1 %v6157_v54  ;;  %v6661_v20 = vand.u32 4294901760, %v1707_v14 }
  0xef   : > { %5608 = vmatpush3.msra.mxu1 %v1304_v52  ;;  %5590 = vmatprep.subr.mxu0 %v6157_v54  ;;  %v1826_v12 = vand.u32 4294901760, %v6702_v21 }
  0xf0   : > { %5609 = vmatprep.subr.mxu1 %v6157_v54  ;;  %5591 = vmatpush3.msra.mxu0 %v6495_v23  ;;  %v6680_v37 = vsub.f32 %v1707_v14, %v6661_v20 }
  0xf1   : > { %5610 = vmatpush3.msra.mxu1 %v1311_v55  ;;  %5592 = vmatprep.subr.mxu0 %v6157_v54 }
  0xf2   : > { %5611 = vmatprep.subr.mxu1 %v6157_v54  ;;  %5593 = vmatpush3.msra.mxu0 %v6504_v26  ;;  %v1812_v41 = vand.u32 4294901760, %v6680_v37 }
  0xf3   : > { %5612 = vmatpush3.msra.mxu1 %v1318_v56  ;;  %5594 = vmatprep.subr.mxu0 %v6157_v54 }
  0xf4   : > { %5613 = vmatprep.subr.mxu1 %v6157_v54  ;;  %5617 = vmatprep.mubr.msk.f32.mxu1 %vm6158_vm2, %v6157_v54 }
  0xf5   : > { %5614 = vmatpush3.msra.mxu1 %v1325_v53  ;;  %5595 = vmatpush3.msra.mxu0 %v6516_v32 }
  0xf6   : > { %5615 = vmatprep.subr.mxu1 %v6157_v54  ;;  %5596 = vmatprep.subr.mxu0 %v6157_v54 }
  0xf7   : > { %5616 = vmatpush3.msra.mxu1 %v1332_v59  ;;  %5597 = vmatpush3.msra.mxu0 %v6527_v13 }
  0xf8   : > { %5635 = vmatprep.subr.mxu1 %v6157_v54  ;;  %5598 = vmatprep.subr.mxu0 %v6157_v54 }
  0xf9   : > { %5599 = vmatpush3.msra.mxu0 %v6540_v46  ;;  %5602 = vmatprep.mubr.msk.f32.mxu0 %vm6158_vm2, %v6157_v54 }
  0xfa   : > { %5600 = vmatprep.subr.mxu0 %v6157_v54 }
  0xfb   : > { %5601 = vmatpush3.msra.mxu0 %v6550_v47 }
  0xfc   : > { %5620 = vmatprep.subr.mxu0 %v6157_v54 }
 0x138   : > { %v1161_v60 = vpop.xlane.xlu1 %1160 }
 0x139   : > { %v1162_v61 = vmul.f32 0.020833334, %v1161_v60 }
 0x13b   : > { %v1163_v62 = vadd.f32 1e-05, %v1162_v61 }
 0x13d   : > { %6053 = vrsqrt.f32 %v1163_v62 }
 0x14a   : > { %v6054_v63 = vpop.eup %6053 }
 0x14b   : > { %v1165_v4 = vmul.f32 %v6054_v63, %v6441_v58 }
 0x14d   : > { %v1173_v6 = vmul.f32 %v5188_v1, %v1165_v4 }
 0x14f   : > { %v1181_v0 = vadd.f32 %v5189_v5, %v1173_v6 }
 0x151   : > { %v1189_v7 = vsel %vm1151_vm0, %v1181_v0, 0 }
 0x152   : > { %v6631_v8 = vand.u32 4294901760, %v1189_v7 }
 0x154   : > { %5618 = vmatmul.mubr.f32.vlgmr.msra.gmra.mxu1 %v6631_v8  ;;  %v6635_v9 = vsub.f32 %v1189_v7, %v6631_v8 }
 0x155   : > { %5636 = vmatpush3.msra.mxu1 %v6495_v23  ;;  %5647 = vmatprep.mubr.msk.f32.mxu1 %vm6158_vm2, %v6157_v54 }
 0x156   : > { %5637 = vmatprep.subr.mxu1 %v6157_v54  ;;  %v6642_v58 = vand.u32 4294901760, %v6635_v9 }
 0x157   : > { %5638 = vmatpush3.msra.mxu1 %v6504_v26 }
 0x158   : > { %5639 = vmatprep.subr.mxu1 %v6157_v54  ;;  %v1265_v10 = vsub.f32 %v6635_v9, %v6642_v58 }
 0x159   : > { %5640 = vmatpush3.msra.mxu1 %v6516_v32 }
 0x15a   : > { %5641 = vmatprep.subr.mxu1 %v6157_v54  ;;  %v6653_v15 = vand.u32 4294901760, %v1265_v10 }
 0x15b   : > { %5642 = vmatpush3.msra.mxu1 %v6527_v13 }
 0x15c   : > { %5643 = vmatprep.subr.mxu1 %v6157_v54  ;;  %5603 = vmatmul.mubr.f32.vlgmr.msra.gmra.mxu0 %v6653_v15 }
 0x15d   : > { %5621 = vmatpush3.msra.mxu0 %v6514_v30  ;;  %5644 = vmatpush3.msra.mxu1 %v6540_v46 }
 0x15e   : > { %5622 = vmatprep.subr.mxu0 %v6157_v54  ;;  %5645 = vmatprep.subr.mxu1 %v6157_v54 }
 0x15f   : > { %5623 = vmatpush3.msra.mxu0 %v6525_v42  ;;  %5646 = vmatpush3.msra.mxu1 %v6550_v47 }
 0x160   : > { %5624 = vmatprep.subr.mxu0 %v6157_v54  ;;  %5648 = vmatmul.mubr.f32.vlgmr.msra.gmra.mxu1 %v6642_v58 }
 0x161   : > { %5665 = vmatprep.subr.mxu1 %v6157_v54  ;;  %5625 = vmatpush3.msra.mxu0 %v6538_v45 }
 0x162   : > { %5666 = vmatpush3.msra.mxu1 %v6495_v23  ;;  %5626 = vmatprep.subr.mxu0 %v6157_v54  ;;  %v6709_v23 = vand.u32 4294901760, %v1703_v39 }
 0x163   : > { %5667 = vmatprep.subr.mxu1 %v6157_v54  ;;  %5627 = vmatpush3.msra.mxu0 %v6548_v28 }
 0x164   : > { %5668 = vmatpush3.msra.mxu1 %v6504_v26  ;;  %5628 = vmatprep.subr.mxu0 %v6157_v54  ;;  %v6715_v26 = vsub.f32 %v1704_v35, %v6691_v38  ;;  %v6731_v44 = vsub.f32 %v1703_v39, %v6709_v23 }
 0x165   : > { %5669 = vmatprep.subr.mxu1 %v6157_v54  ;;  %5629 = vmatpush3.msra.mxu0 %v6561_v49 }
 0x166   : > { %5670 = vmatpush3.msra.mxu1 %v6516_v32  ;;  %5630 = vmatprep.subr.mxu0 %v6157_v54  ;;  %v1813_v32 = vsub.f32 %v6680_v37, %v1812_v41  ;;  %v1833_v18 = vand.u32 4294901760, %v6715_v26 }
 0x167   : > { %5671 = vmatprep.subr.mxu1 %v6157_v54  ;;  %5631 = vmatpush3.msra.mxu0 %v6572_v50 }
 0x168   : > { %5632 = vmatprep.mubr.msk.f32.mxu0 %vm6158_vm2, %v6157_v54  ;;  %5672 = vmatpush3.msra.mxu1 %v6527_v13  ;;  %v1820_v13 = vsub.f32 %v6689_v3, %v1819_v25  ;;  %v1814_v30 = vand.u32 4294901760, %v1813_v32  ;;  %v1834_v42 = vsub.f32 %v6715_v26, %v1833_v18 }
 0x169   : > { %5633 = vmatmul.mubr.f32.vlgmr.msra.gmra.mxu0 %v6635_v9  ;;  %5650 = vmatprep.subr.mxu0 %v6157_v54 }
 0x16a   : > { %5673 = vmatprep.subr.mxu1 %v6157_v54  ;;  %5651 = vmatpush3.msra.mxu0 %v1295_v27  ;;  %v1827_v27 = vsub.f32 %v6702_v21, %v1826_v12  ;;  %v1821_v36 = vand.u32 4294901760, %v1820_v13  ;;  %v1835_v45 = vand.u32 4294901760, %v1834_v42 }
 0x16b   : > { %5674 = vmatpush3.msra.mxu1 %v6540_v46  ;;  %5652 = vmatprep.subr.mxu0 %v6157_v54  ;;  %v1840_v46 = vand.u32 4294901760, %v6731_v44 }
 0x16c   : > { %5675 = vmatprep.subr.mxu1 %v6157_v54  ;;  %5653 = vmatpush3.msra.mxu0 %v1302_v17  ;;  %v1847_v17 = vand.u32 4294901760, %v6743_v19 }
 0x16d   : > { %5676 = vmatpush3.msra.mxu1 %v6550_v47  ;;  %5677 = vmatprep.mubr.msk.f32.mxu1 %vm6158_vm2, %v6157_v54  ;;  %v1828_v47 = vand.u32 4294901760, %v1827_v27  ;;  %v1841_v24 = vsub.f32 %v6731_v44, %v1840_v46 }
 0x16e   : > { %5654 = vmatprep.subr.mxu0 %v6157_v54  ;;  %5678 = vmatmul.mubr.f32.vlgmr.msra.gmra.mxu1 %v6631_v8 }
 0x16f   : > { %5695 = vmatprep.subr.mxu1 %v6157_v54  ;;  %5655 = vmatpush3.msra.mxu0 %v1309_v29  ;;  %v1848_v29 = vsub.f32 %v6743_v19, %v1847_v17  ;;  %v1842_v28 = vand.u32 4294901760, %v1841_v24 }
 0x170   : > { %5696 = vmatpush3.msra.mxu1 %v1814_v30  ;;  %5656 = vmatprep.subr.mxu0 %v6157_v54 }
 0x171   : > { %5697 = vmatprep.subr.mxu1 %v6157_v54  ;;  %5657 = vmatpush3.msra.mxu0 %v1316_v31  ;;  %v1849_v49 = vand.u32 4294901760, %v1848_v29 }
 0x172   : > { %5698 = vmatpush3.msra.mxu1 %v1821_v36  ;;  %5658 = vmatprep.subr.mxu0 %v6157_v54 }
 0x173   : > { %5699 = vmatprep.subr.mxu1 %v6157_v54  ;;  %5659 = vmatpush3.msra.mxu0 %v1323_v51 }
 0x174   : > { %5700 = vmatpush3.msra.mxu1 %v1828_v47  ;;  %5660 = vmatprep.subr.mxu0 %v6157_v54 }
 0x175   : > { %5701 = vmatprep.subr.mxu1 %v6157_v54  ;;  %5661 = vmatpush3.msra.mxu0 %v1330_v48 }
 0x176   : > { %5662 = vmatprep.mubr.msk.f32.mxu0 %vm6158_vm2, %v6157_v54  ;;  %5702 = vmatpush3.msra.mxu1 %v1835_v45 }
 0x177   : > { %5663 = vmatmul.mubr.f32.vlgmr.msra.gmra.mxu0 %v6631_v8  ;;  %5680 = vmatprep.subr.mxu0 %v6157_v54 }
 0x178   : > { %5703 = vmatprep.subr.mxu1 %v6157_v54  ;;  %5681 = vmatpush3.msra.mxu0 %v6661_v20 }
 0x179   : > { %5704 = vmatpush3.msra.mxu1 %v1842_v28  ;;  %5682 = vmatprep.subr.mxu0 %v6157_v54 }
 0x17a   : > { %5705 = vmatprep.subr.mxu1 %v6157_v54  ;;  %5683 = vmatpush3.msra.mxu0 %v6670_v34 }
 0x17b   : > { %5706 = vmatpush3.msra.mxu1 %v1849_v49  ;;  %5707 = vmatprep.mubr.msk.f32.mxu1 %vm6158_vm2, %v6157_v54 }
 0x17c   : > { %5684 = vmatprep.subr.mxu0 %v6157_v54  ;;  %5708 = vmatmul.mubr.f32.vlgmr.msra.gmra.mxu1 %v6631_v8 }
 0x17d   : > { %5725 = vmatprep.subr.mxu1 %v6157_v54  ;;  %5685 = vmatpush3.msra.mxu0 %v6682_v2 }
 0x17e   : > { %5726 = vmatpush3.msra.mxu1 %v6661_v20  ;;  %5686 = vmatprep.subr.mxu0 %v6157_v54 }
 0x17f   : > { %5727 = vmatprep.subr.mxu1 %v6157_v54  ;;  %5687 = vmatpush3.msra.mxu0 %v6691_v38 }
 0x180   : > { %5728 = vmatpush3.msra.mxu1 %v6670_v34  ;;  %5688 = vmatprep.subr.mxu0 %v6157_v54 }
 0x181   : > { %5729 = vmatprep.subr.mxu1 %v6157_v54  ;;  %5689 = vmatpush3.msra.mxu0 %v6709_v23 }
 0x182   : > { %5730 = vmatpush3.msra.mxu1 %v6682_v2  ;;  %5690 = vmatprep.subr.mxu0 %v6157_v54 }
 0x183   : > { %5731 = vmatprep.subr.mxu1 %v6157_v54  ;;  %5691 = vmatpush3.msra.mxu0 %v6719_v11 }
 0x184   : > { %5692 = vmatprep.mubr.msk.f32.mxu0 %vm6158_vm2, %v6157_v54  ;;  %5732 = vmatpush3.msra.mxu1 %v6691_v38 }
 0x185   : > { %5693 = vmatmul.mubr.f32.vlgmr.msra.gmra.mxu0 %v6653_v15  ;;  %5710 = vmatprep.subr.mxu0 %v6157_v54 }
 0x186   : > { %5733 = vmatprep.subr.mxu1 %v6157_v54  ;;  %5711 = vmatpush3.msra.mxu0 %v6680_v37  ;;  %v5513_v50 = vpop.f32.mrf.mxu1 }
 0x187   : > { %5734 = vmatpush3.msra.mxu1 %v6709_v23  ;;  %5712 = vmatprep.subr.mxu0 %v6157_v54 }
 0x188   : > { %5735 = vmatprep.subr.mxu1 %v6157_v54  ;;  %5713 = vmatpush3.msra.mxu0 %v6689_v3  ;;  %v771_v40 = vpop.f32.mrf.mxu1 }
 0x189   : > { %5736 = vmatpush3.msra.mxu1 %v6719_v11  ;;  %5737 = vmatprep.mubr.msk.f32.mxu1 %vm6158_vm2, %v6157_v54 }
 0x18a   : > { %5714 = vmatprep.subr.mxu0 %v6157_v54  ;;  %5738 = vmatmul.mubr.f32.vlgmr.msra.gmra.mxu1 %v6642_v58 }
 0x18b   : > { %5755 = vmatprep.subr.mxu1 %v6157_v54  ;;  %5715 = vmatpush3.msra.mxu0 %v6702_v21 }
 0x18c   : > { %5756 = vmatpush3.msra.mxu1 %v6661_v20  ;;  %5716 = vmatprep.subr.mxu0 %v6157_v54 }
 0x18d   : > { %5757 = vmatprep.subr.mxu1 %v6157_v54  ;;  %5717 = vmatpush3.msra.mxu0 %v6715_v26 }
 0x18e   : > { %5758 = vmatpush3.msra.mxu1 %v6670_v34  ;;  %5718 = vmatprep.subr.mxu0 %v6157_v54  ;;  %v5494_v31 = vpop.f32.mrf.mxu0 }
 0x18f   : > { %5759 = vmatprep.subr.mxu1 %v6157_v54  ;;  %5719 = vmatpush3.msra.mxu0 %v6731_v44  ;;  %v778_v51 = vadd.f32 %v5513_v50, %v5494_v31 }
 0x190   : > { %5760 = vmatpush3.msra.mxu1 %v6682_v2  ;;  %5720 = vmatprep.subr.mxu0 %v6157_v54  ;;  %v650_v52 = vpop.f32.mrf.mxu0 }
 0x191   : > { %5761 = vmatprep.subr.mxu1 %v6157_v54  ;;  %5721 = vmatpush3.msra.mxu0 %v6743_v19  ;;  %v772_v57 = vadd.f32 %v771_v40, %v650_v52  ;;  %v6906_v40 = vld [vmem:[%s7360_s13] sm:$0x1] }
 0x192   : > { %5722 = vmatprep.mubr.msk.f32.mxu0 %vm6158_vm2, %v6157_v54  ;;  %5762 = vmatpush3.msra.mxu1 %v6691_v38 }
 0x193   : > { %5723 = vmatmul.mubr.f32.vlgmr.msra.gmra.mxu0 %v6635_v9  ;;  %5740 = vmatprep.subr.mxu0 %v6157_v54 }
 0x194   : > { %5763 = vmatprep.subr.mxu1 %v6157_v54  ;;  %5741 = vmatpush3.msra.mxu0 %v1812_v41 }
 0x195   : > { %5764 = vmatpush3.msra.mxu1 %v6709_v23  ;;  %5742 = vmatprep.subr.mxu0 %v6157_v54 }
 0x196   : > { %5765 = vmatprep.subr.mxu1 %v6157_v54  ;;  %5743 = vmatpush3.msra.mxu0 %v1819_v25 }
 0x197   : > { %5766 = vmatpush3.msra.mxu1 %v6719_v11  ;;  %5767 = vmatprep.mubr.msk.f32.mxu1 %vm6158_vm2, %v6157_v54 }
 0x198   : > { %5744 = vmatprep.subr.mxu0 %v6157_v54  ;;  %5768 = vmatmul.mubr.f32.vlgmr.msra.gmra.mxu1 %v6631_v8  ;;  %v5551_v43 = vpop.f32.mrf.mxu1 }
 0x199   : > { %5745 = vmatpush3.msra.mxu0 %v1826_v12  ;;  %5752 = vmatprep.mubr.msk.f32.mxu0 %vm6158_vm2, %v6157_v54 }
 0x19a   : > { %5746 = vmatprep.subr.mxu0 %v6157_v54  ;;  %v953_v59 = vpop.f32.mrf.mxu1 }
 0x19b   : > { %5747 = vmatpush3.msra.mxu0 %v1833_v18 }
 0x19c   : > { %5748 = vmatprep.subr.mxu0 %v6157_v54 }
 0x19d   : > { %5749 = vmatpush3.msra.mxu0 %v1840_v46 }
 0x19e   : > { %5750 = vmatprep.subr.mxu0 %v6157_v54  ;;  %v5532_v48 = vpop.f32.mrf.mxu0 }
 0x19f   : > { %5751 = vmatpush3.msra.mxu0 %v1847_v17  ;;  %v873_v55 = vadd.f32 %v5532_v48, %v778_v51  ;;  %v5190_v17 = vld [vmem:[%s7358_s11] ss:$0 sm:$0xff] }
 0x1a0   : > { %5753 = vmatmul.mubr.f32.vlgmr.msra.gmra.mxu0 %v6631_v8  ;;  %v865_v53 = vpop.f32.mrf.mxu0 }
 0x1a1   : > { %v962_v56 = vadd.f32 %v5551_v43, %v873_v55  ;;  %v866_v60 = vadd.f32 %v865_v53, %v772_v57  ;;  %v6911_v55 = vmul.f32 %v6906_v40, %v6906_v40 }
 0x1a3   : > { %v954_v62 = vadd.f32 %v953_v59, %v866_v60 }
 0x1ab   : > { %v5589_v61 = vpop.f32.mrf.mxu1 }
 0x1ad   : > { %v1141_v5 = vpop.f32.mrf.mxu1 }
 0x1ae   : > { %v5570_v63 = vpop.f32.mrf.mxu0 }
 0x1af   : > { %v1063_v1 = vadd.f32 %v5570_v63, %v962_v56 }
 0x1b0   : > { %v1056_v4 = vpop.f32.mrf.mxu0 }
 0x1b1   : > { %v1057_v54 = vadd.f32 %v1056_v4, %v954_v62  ;;  %v6871_v6 = vadd.f32 %v5589_v61, %v1063_v1  ;;  %v2266_v61 = vsel %vm2265_vm4, %v6911_v55, 0.0 }
 0x1b3   : > { %v6873_v0 = vadd.f32 %v1141_v5, %v1057_v54  ;;  %v2224_v11 = vmul.f32 %v6871_v6, %v6871_v6 }
 0x1b5   : > { %v2223_v7 = vmul.f32 %v6873_v0, %v6873_v0  ;;  %v2229_v12 = vsel %vm2225_vm3, %v2224_v11, 0.0 }
 0x1b7   : > { %v2226_v8 = vsel %vm2225_vm3, %v2223_v7, 0.0 }
 0x1b8   : > { %2227 = vadd.xlane.f32.xlu1 %v2226_v8  ;;  %v2258_v8 = vlaneseq }
 0x214   : > { %v1369_v9 = vpop.f32.mrf.mxu1 }
 0x216   : > { %v5619_v58 = vpop.f32.mrf.mxu1 }
 0x21c   : > { %v1268_v10 = vpop.f32.mrf.mxu0 }
 0x21d   : > { %v1370_v35 = vadd.f32 %v1369_v9, %v1268_v10 }
 0x21e   : > { %v5604_v14 = vpop.f32.mrf.mxu0 }
 0x21f   : > { %v2259_v14 = vshrl.u32 %v2258_v8, 7 }
 0x220   : > { %v1532_v15 = vpop.f32.mrf.mxu1 }
 0x222   : > { %v5649_v16 = vpop.f32.mrf.mxu1 }
 0x223   : > { %v6923_v16 = vsub.s32 0, %v2259_v14 }
 0x229   : > { %v1453_v20 = vpop.f32.mrf.mxu0 }
 0x22a   : > { %v1454_v2 = vadd.f32 %v1453_v20, %v1370_v35 }
 0x22b   : > { %v5634_v33 = vpop.f32.mrf.mxu0 }
 0x22c   : > { %v1533_v3 = vadd.f32 %v1532_v15, %v1454_v2  ;;  %v6929_v33 = vld [vmem:[%s7359_s12] sm:$0x1] }
 0x22e   : > { %v1698_v34 = vpop.f32.mrf.mxu1 }
 0x230   : > { %v5679_v37 = vpop.f32.mrf.mxu1 }
 0x237   : > { %v1621_v38 = vpop.f32.mrf.mxu0 }
 0x238   : > { %v1622_v39 = vadd.f32 %v1621_v38, %v1533_v3 }
 0x239   : > { %v5664_v41 = vpop.f32.mrf.mxu0 }
 0x23a   : > { %v6878_v21 = vadd.f32 %v1698_v34, %v1622_v39  ;;  %v2261_v34 = vrot.slane %v6929_v33, %v6923_v16 }
 0x23c   : > { %v1886_v22 = vpop.f32.mrf.mxu1  ;;  %v2249_v23 = vmul.f32 %v6878_v21, %v6878_v21 }
 0x23e   : > { %v5709_v25 = vpop.f32.mrf.mxu1  ;;  %3362 = vrot.lane.b32.xlu1 %v2249_v23, %s6159_s25  ;;  %v2250_v26 = vsel %vm2225_vm3, %v2249_v23, 0.0 }
 0x23f   : > { %2251 = vadd.xlane.f32.xlu0 %v2250_v26 }
 0x241   : > { %v2228_v32 = vpop.xlane.xlu1 %2227 }
 0x242   : > { %3338 = vrot.lane.b32.xlu1 %v2224_v11, %s6159_s25  ;;  %v2233_v44 = vmul.f32 0.03125, %v2228_v32 }
 0x243   : > { %2230 = vadd.xlane.f32.xlu0 %v2229_v12 }
 0x244   : > { %v2235_v13 = vadd.f32 1e-08, %v2233_v44 }
 0x245   : > { %v1785_v18 = vpop.f32.mrf.mxu0 }
 0x246   : > { %v1887_v19 = vadd.f32 %v1886_v22, %v1785_v18  ;;  %6055 = vrsqrt.f32 %v2235_v13 }
 0x247   : > { %v5694_v30 = vpop.f32.mrf.mxu0 }
 0x24a   : > { %v2049_v27 = vpop.f32.mrf.mxu1 }
 0x24c   : > { %v5739_v46 = vpop.f32.mrf.mxu1 }
 0x253   : > { %v6056_v36 = vpop.eup %6055  ;;  %v1970_v42 = vpop.f32.mrf.mxu0 }
 0x254   : > { %v1971_v47 = vadd.f32 %v1970_v42, %v1887_v19  ;;  %v2239_v24 = vmul.f32 %v6056_v36, %v6873_v0 }
 0x255   : > { %v5724_v45 = vpop.f32.mrf.mxu0 }
 0x256   : > { %v2050_v29 = vadd.f32 %v2049_v27, %v1971_v47  ;;  %v6892_v28 = vmul.f32 %v5190_v17, %v2239_v24 }
 0x258   : > { %v2215_v49 = vpop.f32.mrf.mxu1  ;;  %v2275_v31 = vsel %vm2225_vm3, %v6892_v28, 0 }
 0x259   : > { %3336 = vrot.lane.b32.xlu0 %v2223_v7, %s6159_s25  ;;  %v6897_v50 = vand.u32 4294901760, %v2275_v31 }
 0x25a   : > { %v5769_v51 = vpop.f32.mrf.mxu1 }
 0x25b   : > { %5777 = vmatprep.mubr.f32.mxu1 %v6897_v50  ;;  %v6901_v52 = vsub.f32 %v2275_v31, %v6897_v50 }
 0x25d   : > { %v2351_v48 = vand.u32 4294901760, %v6901_v52 }
 0x25f   : > { %v2352_v43 = vsub.f32 %v6901_v52, %v2351_v48 }
 0x260   : > { %v2138_v56 = vpop.f32.mrf.mxu0 }
 0x261   : > { %v2139_v57 = vadd.f32 %v2138_v56, %v2050_v29  ;;  %v2353_v53 = vand.u32 4294901760, %v2352_v43  ;;  %v527_v43 = vld [vmem:[%s523_s27] sm:$0x1]  ;;  %s5095_s27 = sshll.u32 %s511_s20, 4  ;;  %s7303_s27 = int_to_ptr.vmem [resolvable:$true] %s5095_s27 }
 0x262   : > { %v5754_v59 = vpop.f32.mrf.mxu0  ;;  %s6095_s17 = scalar_lea.vmem %s7303_s27, 256 }
 0x263   : > { %v6916_v60 = vadd.f32 %v2215_v49, %v2139_v57  ;;  %5772 = vmatprep.mubr.f32.mxu0 %v2353_v53  ;;  %p6096_p11 = scmp.ne.s32.totalorder %s7303_s27, %s6095_s17 }
 0x265   : > { %v6938_v26 = vand.u32 4294901760, %v6916_v60  ;;  %p6097_p12 = pnand %p6096_p11, %p6282_p5 }
 0x266   : > { %2267 = vadd.xlane.f32.xlu1 %v2266_v61 }
 0x267   : > { %v6942_v13 = vsub.f32 %v6916_v60, %v6938_v26  ;;  %p6098_p13 = pneg %p6097_p12 }
 0x269   : > { %v6946_v46 = vand.u32 4294901760, %v6942_v13 }
 0x2b0   : > { %v3363_v62 = vpop.permute.xlu1 %3362 }
 0x2b1   : > { %v3365_v20 = vsel %vm2225_vm3, %v3363_v62, 0.0  ;;  %v5186_v62 = vadd.f32 -1.0, %v527_v43 }
 0x2b4   : > { %v3339_v63 = vpop.permute.xlu1 %3338 }
 0x2b5   : > { %v3345_v1 = vsel %vm2225_vm3, %v3339_v63, 0.0 }
 0x2b6   : > { %3346 = vadd.xlane.f32.xlu1 %v3345_v1 }
 0x2c7   : > { %3356 = vrot.lane.b32.xlu1 %v5190_v17, %s6160_s24 }
 0x2c8   : > { %v2252_v4 = vpop.xlane.xlu0 %2251 }
 0x2c9   : > { %v2253_v5 = vmul.f32 0.03125, %v2252_v4 }
 0x2cb   : > { %v2254_v54 = vadd.f32 1e-08, %v2253_v5 }
 0x2cc   : > { %v2231_v7 = vpop.xlane.xlu0 %2230 }
 0x2cd   : > { %6057 = vrsqrt.f32 %v2254_v54  ;;  %v2234_v9 = vmul.f32 0.03125, %v2231_v7 }
 0x2cf   : > { %v2236_v58 = vadd.f32 1e-08, %v2234_v9  ;;  %v529_v9 = vmul.f32 1e+30, %v5186_v62 }
 0x2d0   : > { %v3337_v10 = vpop.permute.xlu0 %3336 }
 0x2d1   : > { %6059 = vrsqrt.f32 %v2236_v58  ;;  %v3342_v15 = vsel %vm2225_vm3, %v3337_v10, 0.0 }
 0x2d2   : > { %3343 = vadd.xlane.f32.xlu0 %v3342_v15 }
 0x2d6   : > { %3366 = vadd.xlane.f32.xlu0 %v3365_v20 }
 0x2da   : > { %v6058_v35 = vpop.eup %6057 }
 0x2db   : > { %v2256_v37 = vmul.f32 %v6058_v35, %v6878_v21 }
 0x2dd   : > { %v2263_v2 = vmul.f32 %v2261_v34, %v2256_v37 }
 0x2de   : > { %v6060_v3 = vpop.eup %6059 }
 0x2df   : > { %v2281_v38 = vsel %vm2225_vm3, %v2263_v2, 0  ;;  %v2240_v39 = vmul.f32 %v6060_v3, %v6871_v6 }
 0x2e0   : > { %v2314_v41 = vand.u32 4294901760, %v2281_v38 }
 0x2e1   : > { %v2248_v22 = vmul.f32 %v5190_v17, %v2240_v39  ;;  %v2961_v17 = vsub.f32 %v6942_v13, %v6946_v46 }
 0x2e2   : > { %5770 = vmatprep.subr.mxu0 %v2314_v41  ;;  %v2401_v23 = vsub.f32 %v2281_v38, %v2314_v41 }
 0x2e3   : > { %5771 = vmatpush3.xpose.msra.mxu0 %v2314_v41  ;;  %v2278_v25 = vsel %vm2225_vm3, %v2248_v22, 0  ;;  %v2962_v24 = vand.u32 4294901760, %v2961_v17 }
 0x2e4   : > { %5780 = vmatprep.subr.mxu0 %v2401_v23  ;;  %v2402_v11 = vand.u32 4294901760, %v2401_v23  ;;  %v2359_v32 = vand.u32 4294901760, %v2278_v25 }
 0x2e6   : > { %v2403_v12 = vsub.f32 %v2401_v23, %v2402_v11  ;;  %v2360_v44 = vsub.f32 %v2278_v25, %v2359_v32 }
 0x2e8   : > { %v2404_v18 = vand.u32 4294901760, %v2403_v12  ;;  %v2361_v19 = vand.u32 4294901760, %v2360_v44 }
 0x2ea   : > { %5775 = vmatprep.subr.mxu1 %v2404_v18  ;;  %v2362_v30 = vsub.f32 %v2360_v44, %v2361_v19 }
 0x2eb   : > { %5776 = vmatpush3.xpose.msra.mxu1 %v2404_v18 }
 0x2ec   : > { %5785 = vmatprep.subr.mxu1 %v2314_v41  ;;  %3372 = vrot.lane.b32.xlu0 %v2261_v34, %s6160_s24  ;;  %v2363_v27 = vand.u32 4294901760, %v2362_v30 }
 0x2ee   : > { %5773 = vmatmul.mubr.f32.vlgmr.msra.gmra.mxu0 %v2363_v27  ;;  %5778 = vmatmul.mubr.f32.vlgmr.msra.gmra.mxu1 %v2359_v32 }
 0x2ef   : > { %5781 = vmatpush3.xpose.msra.mxu0 %v2401_v23  ;;  %5782 = vmatprep.mubr.f32.mxu0 %v6901_v52  ;;  %v2268_v36 = vpop.xlane.xlu1 %2267 }
 0x2f0   : > { %5786 = vmatpush3.xpose.msra.mxu1 %v2314_v41  ;;  %5787 = vmatprep.mubr.f32.mxu1 %v2351_v48  ;;  %v2269_v42 = vmul.f32 0.03125, %v2268_v36 }
 0x2f1   : > { %5790 = vmatprep.subr.mxu0 %v2402_v11  ;;  %5795 = vmatprep.subr.mxu1 %v2314_v41 }
 0x2f2   : > { %v2270_v47 = vadd.f32 1e-08, %v2269_v42  ;;  %5783 = vmatmul.mubr.f32.vlgmr.msra.gmra.mxu0 %v2360_v44 }
 0x2f3   : > { %5788 = vmatmul.mubr.f32.vlgmr.msra.gmra.mxu1 %v2361_v19  ;;  %5791 = vmatpush3.xpose.msra.mxu0 %v2402_v11 }
 0x2f4   : > { %6061 = vrsqrt.f32 %v2270_v47  ;;  %5792 = vmatprep.mubr.f32.mxu0 %v6897_v50  ;;  %5796 = vmatpush3.xpose.msra.mxu1 %v2314_v41 }
 0x2f5   : > { %5797 = vmatprep.mubr.f32.mxu1 %v6897_v50  ;;  %5800 = vmatprep.subr.mxu0 %v6938_v26 }
 0x2f6   : > { %5805 = vmatprep.subr.mxu1 %v2962_v24  ;;  %5793 = vmatmul.mubr.f32.vlgmr.msra.gmra.mxu0 %v2359_v32 }
 0x2f7   : > { %5798 = vmatmul.mubr.f32.vlgmr.msra.gmra.mxu1 %v2359_v32  ;;  %5801 = vmatpush3.msra.mxu0 %v6938_v26 }
 0x2f8   : > { %5806 = vmatpush3.msra.mxu1 %v2962_v24  ;;  %5810 = vmatprep.subr.mxu0 %v6942_v13 }
 0x2f9   : > { %5815 = vmatprep.subr.mxu1 %v6938_v26 }
 0x301   : > { %v6062_v45 = vpop.eup %6061 }
 0x302   : > { %v2272_v29 = vmul.f32 %v6062_v45, %v6906_v40 }
 0x304   : > { %v2273_v49 = vmul.f32 %v2272_v29, %v6929_v33 }
 0x306   : > { %v2786_v31 = vrot.slane %v2273_v49, %v6923_v16 }
 0x308   : > { %v2789_v50 = vmul.f32 %v2786_v31, %v2248_v22  ;;  %v2788_v51 = vmul.f32 %v2786_v31, %v6892_v28  ;;  %v6970_v22 = vrot.slane %v529_v9, %v6923_v16 }
 0x30a   : > { %v2793_v52 = vsel %vm2225_vm3, %v2789_v50, 0.0  ;;  %v2790_v48 = vsel %vm2225_vm3, %v2788_v51, 0.0 }
 0x30b   : > { %2794 = vadd.xlane.f32.xlu0 %v2793_v52  ;;  %2791 = vadd.xlane.f32.xlu1 %v2790_v48 }
 0x33f   : > { %v3347_v7 = vpop.xlane.xlu1 %3346 }
 0x340   : > { %v3349_v20 = vmul.f32 0.03125, %v3347_v7 }
 0x342   : > { %v3351_v11 = vadd.f32 1e-08, %v3349_v20 }
 0x343   : > { %v3357_v24 = vpop.permute.xlu1 %3356 }
 0x35b   : > { %v3344_v53 = vpop.xlane.xlu0 %3343 }
 0x35c   : > { %v3348_v28 = vmul.f32 0.03125, %v3344_v53 }
 0x35e   : > { %v3350_v34 = vadd.f32 1e-08, %v3348_v28 }
 0x35f   : > { %v3367_v35 = vpop.xlane.xlu0 %3366 }
 0x360   : > { %v3368_v23 = vmul.f32 0.03125, %v3367_v35  ;;  %6063 = vrsqrt.f32 %v3350_v34 }
 0x361   : > { %6065 = vrsqrt.f32 %v3351_v11 }
 0x362   : > { %v3369_v19 = vadd.f32 1e-08, %v3368_v23 }
 0x363   : > { %v3373_v51 = vpop.permute.xlu0 %3372 }
 0x364   : > { %6067 = vrsqrt.f32 %v3369_v19 }
 0x36d   : > { %v6064_v42 = vpop.eup %6063 }
 0x36e   : > { %v3354_v17 = vmul.f32 %v6064_v42, %v6873_v0  ;;  %v6066_v47 = vpop.eup %6065  ;;  %v3380_v0 = vrot.slane %v6911_v55, %v6923_v16 }
 0x36f   : > { %v3355_v29 = vmul.f32 %v6066_v47, %v6871_v6 }
 0x370   : > { %v6978_v49 = vmul.f32 %v3357_v24, %v3354_v17 }
 0x371   : > { %v6068_v45 = vpop.eup %6067  ;;  %v6983_v50 = vmul.f32 %v3357_v24, %v3355_v29 }
 0x372   : > { %v3371_v31 = vmul.f32 %v6068_v45, %v6878_v21 }
 0x374   : > { %v3375_v52 = vmul.f32 %v3373_v51, %v3371_v31 }
 0x394   : > { %v2795_v6 = vpop.xlane.xlu0 %2794  ;;  %v2792_v48 = vpop.xlane.xlu1 %2791 }
 0x395   : > { %v6993_v21 = vmul.f32 0.17677669, %v2795_v6 }
 0x3ae   : > { %v5774_v56 = vpop.f32.mrf.mxu0  ;;  %v5779_v57 = vpop.f32.mrf.mxu1 }
 0x3af   : > { %v2448_v63 = vadd.f32 %v5779_v57, %v5774_v56  ;;  %v6995_v56 = vmul.f32 0.17677669, %v2792_v48 }
 0x3b0   : > { %v2355_v59 = vpop.f32.mrf.mxu0  ;;  %v2441_v61 = vpop.f32.mrf.mxu1 }
 0x3b1   : > { %v2442_v4 = vadd.f32 %v2441_v61, %v2355_v59 }
 0x3b2   : > { %v5784_v1 = vpop.f32.mrf.mxu0 }
 0x3b3   : > { %v2529_v5 = vadd.f32 %v5784_v1, %v2448_v63  ;;  %v5789_v54 = vpop.f32.mrf.mxu1 }
 0x3b4   : > { %v2521_v8 = vpop.f32.mrf.mxu0 }
 0x3b5   : > { %v2611_v58 = vadd.f32 %v5789_v54, %v2529_v5  ;;  %v2522_v10 = vadd.f32 %v2521_v8, %v2442_v4  ;;  %v2602_v14 = vpop.f32.mrf.mxu1 }
 0x3b6   : > { %v5794_v15 = vpop.f32.mrf.mxu0 }
 0x3b7   : > { %v2603_v37 = vadd.f32 %v2602_v14, %v2522_v10  ;;  %v2691_v2 = vadd.f32 %v5794_v15, %v2611_v58  ;;  %v5799_v3 = vpop.f32.mrf.mxu1 }
 0x3b8   : > { %v2684_v38 = vpop.f32.mrf.mxu0 }
 0x3b9   : > { %v2769_v39 = vadd.f32 %v5799_v3, %v2691_v2  ;;  %v2685_v41 = vadd.f32 %v2684_v38, %v2603_v37  ;;  %v2762_v25 = vpop.f32.mrf.mxu1 }
 0x3bb   : > { %v2773_v32 = vmul.f32 0.17677669, %v2769_v39  ;;  %v2763_v12 = vadd.f32 %v2762_v25, %v2685_v41 }
 0x3bd   : > { %v2772_v44 = vmul.f32 0.17677669, %v2763_v12  ;;  %v2781_v18 = vadd.f32 %v6970_v22, %v2773_v32 }
 0x3bf   : > { %v2802_v30 = vsel %vm2798_vm5, %v2781_v18, -inf  ;;  %v2780_v27 = vadd.f32 %v6970_v22, %v2772_v44 }
 0x3c0   : > { %2803 = vmax.xlane.f32.xlu1 %v2802_v30 }
 0x3c1   : > { %v2799_v36 = vsel %vm2798_vm5, %v2780_v27, -inf }
 0x3c2   : > { %2800 = vmax.xlane.f32.xlu0 %v2799_v36 }
 0x3d1   : > { %3397 = vrot.lane.b32.xlu1 %v6978_v49, %s6159_s25 }
 0x3d5   : > { %3399 = vrot.lane.b32.xlu1 %v6983_v50, %s6159_s25 }
 0x3d8   : > { %3402 = vrot.lane.b32.xlu0 %v3375_v52, %s6159_s25 }
 0x3d9   : > { %3381 = vrot.lane.b32.xlu1 %v3380_v0, %s6159_s25 }
 0x3dd   : > { %3391 = vrot.lane.b32.xlu1 %v6929_v33, %s6160_s24 }
 0x449   : > { %v2804_v43 = vpop.xlane.xlu1 %2803 }
 0x44a   : > { %v6998_v57 = vmax.f32 %v2804_v43, %v6993_v21 }
 0x44b   : > { %v2801_v53 = vpop.xlane.xlu0 %2800 }
 0x44c   : > { %v2808_v55 = vsub.f32 %v2781_v18, %v6998_v57  ;;  %v2814_v59 = vsub.f32 %v6993_v21, %v6998_v57  ;;  %v7004_v61 = vmax.f32 %v2801_v53, %v6995_v56 }
 0x44d   : > { %v3398_v33 = vpop.permute.xlu1 %3397 }
 0x44e   : > { %v2811_v62 = vmul.f32 1.442695, %v2808_v55  ;;  %v2807_v63 = vsub.f32 %v2780_v27, %v7004_v61  ;;  %v2813_v1 = vsub.f32 %v6995_v56, %v7004_v61  ;;  %v3404_v37 = vsel %vm2225_vm3, %v3398_v33, 0 }
 0x44f   : > { %v3403_v5 = vpop.permute.xlu0 %3402  ;;  %v3476_v23 = vand.u32 4294901760, %v3404_v37  ;;  %v2817_v53 = vmul.f32 1.442695, %v2814_v59 }
 0x450   : > { %6069 = vpow2.f32 %v2811_v62  ;;  %v2809_v28 = vmul.f32 1.442695, %v2807_v63  ;;  %v3408_v54 = vsel %vm2225_vm3, %v3403_v5, 0  ;;  %v2815_v55 = vmul.f32 1.442695, %v2813_v1 }
 0x451   : > { %v3400_v4 = vpop.permute.xlu1 %3399  ;;  %v3441_v9 = vand.u32 4294901760, %v3408_v54  ;;  %v3477_v18 = vsub.f32 %v3404_v37, %v3476_v23 }
 0x452   : > { %6071 = vpow2.f32 %v2809_v28  ;;  %v3406_v38 = vsel %vm2225_vm3, %v3400_v4, 0 }
 0x453   : > { %v7011_v58 = vsub.f32 %v3408_v54, %v3441_v9  ;;  %v3486_v32 = vand.u32 4294901760, %v3406_v38  ;;  %v3478_v42 = vand.u32 4294901760, %v3477_v18 }
 0x455   : > { %v3382_v7 = vpop.permute.xlu1 %3381  ;;  %v3529_v35 = vand.u32 4294901760, %v7011_v58  ;;  %v3487_v27 = vsub.f32 %v3406_v38, %v3486_v32 }
 0x456   : > { %v3384_v8 = vsel %vm2265_vm4, %v3382_v7, 0.0 }
 0x457   : > { %3385 = vadd.xlane.f32.xlu0 %v3384_v8  ;;  %v3530_v25 = vsub.f32 %v7011_v58, %v3529_v35  ;;  %v3488_v17 = vand.u32 4294901760, %v3487_v27 }
 0x459   : > { %v3531_v19 = vand.u32 4294901760, %v3530_v25  ;;  %v3489_v47 = vsub.f32 %v3487_v27, %v3488_v17  ;;  %v3392_v51 = vpop.permute.xlu1 %3391 }
 0x45b   : > { %v3490_v24 = vand.u32 4294901760, %v3489_v47 }
 0x45d   : > { %v7013_v10 = vpop.eup %6069 }
 0x45e   : > { %v2839_v14 = vsel %vm2798_vm5, %v7013_v10, 0 }
 0x45f   : > { %v7017_v15 = vpop.eup %6071  ;;  %v2917_v20 = vand.u32 4294901760, %v2839_v14 }
 0x460   : > { %v2836_v34 = vsel %vm2798_vm5, %v7017_v15, 0 }
 0x461   : > { %v2907_v2 = vand.u32 4294901760, %v2836_v34  ;;  %v2918_v3 = vsub.f32 %v2839_v14, %v2917_v20 }
 0x463   : > { %5807 = vmatprep.mubr.f32.mxu1 %v2907_v2  ;;  %v2908_v39 = vsub.f32 %v2836_v34, %v2907_v2  ;;  %v2919_v41 = vand.u32 4294901760, %v2918_v3 }
 0x464   : > { %5808 = vmatmul.mubr.f32.vlgmr.msra.gmra.mxu1 %v2917_v20 }
 0x465   : > { %5816 = vmatpush3.msra.mxu1 %v6938_v26  ;;  %v2909_v11 = vand.u32 4294901760, %v2908_v39  ;;  %v2920_v12 = vsub.f32 %v2918_v3, %v2919_v41 }
 0x466   : > { %5825 = vmatprep.subr.mxu1 %v6938_v26 }
 0x467   : > { %5817 = vmatprep.mubr.f32.mxu1 %v2909_v11  ;;  %v2910_v44 = vsub.f32 %v2908_v39, %v2909_v11  ;;  %v2921_v36 = vand.u32 4294901760, %v2920_v12 }
 0x468   : > { %5818 = vmatmul.mubr.f32.vlgmr.msra.gmra.mxu1 %v2919_v41 }
 0x469   : > { %5826 = vmatpush3.msra.mxu1 %v6938_v26  ;;  %5827 = vmatprep.mubr.f32.mxu1 %v2907_v2  ;;  %v2911_v30 = vand.u32 4294901760, %v2910_v44  ;;  %v3479_v26 = vsub.f32 %v3477_v18, %v3478_v42 }
 0x46a   : > { %5835 = vmatprep.subr.mxu1 %v3531_v19 }
 0x46b   : > { %5802 = vmatprep.mubr.f32.mxu0 %v2911_v30 }
 0x46c   : > { %5803 = vmatmul.mubr.f32.vlgmr.msra.gmra.mxu0 %v2921_v36  ;;  %5828 = vmatmul.mubr.f32.vlgmr.msra.gmra.mxu1 %v2917_v20 }
 0x46d   : > { %5811 = vmatpush3.msra.mxu0 %v6942_v13  ;;  %5836 = vmatpush3.xpose.msra.mxu1 %v3531_v19  ;;  %v3480_v13 = vand.u32 4294901760, %v3479_v26 }
 0x46e   : > { %5812 = vmatprep.mubr.f32.mxu0 %v2908_v39  ;;  %5820 = vmatprep.subr.mxu0 %v6946_v46 }
 0x46f   : > { %5837 = vmatprep.mubr.f32.mxu1 %v3476_v23  ;;  %5845 = vmatprep.subr.mxu1 %v3441_v9 }
 0x470   : > { %5813 = vmatmul.mubr.f32.vlgmr.msra.gmra.mxu0 %v2918_v3  ;;  %5838 = vmatmul.mubr.f32.vlgmr.msra.gmra.mxu1 %v3486_v32 }
 0x471   : > { %5821 = vmatpush3.msra.mxu0 %v6946_v46  ;;  %5846 = vmatpush3.xpose.msra.mxu1 %v3441_v9 }
 0x472   : > { %5822 = vmatprep.mubr.f32.mxu0 %v2907_v2  ;;  %5830 = vmatprep.subr.mxu0 %v3441_v9 }
 0x473   : > { %5847 = vmatprep.mubr.f32.mxu1 %v3478_v42  ;;  %5855 = vmatprep.subr.mxu1 %v3441_v9 }
 0x474   : > { %5823 = vmatmul.mubr.f32.vlgmr.msra.gmra.mxu0 %v2917_v20  ;;  %5848 = vmatmul.mubr.f32.vlgmr.msra.gmra.mxu1 %v3488_v17 }
 0x475   : > { %5831 = vmatpush3.xpose.msra.mxu0 %v3441_v9  ;;  %5856 = vmatpush3.xpose.msra.mxu1 %v3441_v9 }
 0x476   : > { %5832 = vmatprep.mubr.f32.mxu0 %v3480_v13  ;;  %5840 = vmatprep.subr.mxu0 %v7011_v58 }
 0x477   : > { %5857 = vmatprep.mubr.f32.mxu1 %v3476_v23 }
 0x478   : > { %5833 = vmatmul.mubr.f32.vlgmr.msra.gmra.mxu0 %v3490_v24  ;;  %5858 = vmatmul.mubr.f32.vlgmr.msra.gmra.mxu1 %v3486_v32 }
 0x479   : > { %5841 = vmatpush3.xpose.msra.mxu0 %v7011_v58  ;;  %5842 = vmatprep.mubr.f32.mxu0 %v3477_v18 }
 0x47a   : > { %5850 = vmatprep.subr.mxu0 %v3529_v35 }
 0x47c   : > { %5843 = vmatmul.mubr.f32.vlgmr.msra.gmra.mxu0 %v3487_v27 }
 0x47d   : > { %5851 = vmatpush3.xpose.msra.mxu0 %v3529_v35  ;;  %5852 = vmatprep.mubr.f32.mxu0 %v3476_v23 }
 0x480   : > { %5853 = vmatmul.mubr.f32.vlgmr.msra.gmra.mxu0 %v3486_v32 }
 0x4e0   : > { %v3386_v46 = vpop.xlane.xlu0 %3385 }
 0x4e1   : > { %v3387_v45 = vmul.f32 0.03125, %v3386_v46 }
 0x4e3   : > { %v3388_v29 = vadd.f32 1e-08, %v3387_v45 }
 0x4e5   : > { %6073 = vrsqrt.f32 %v3388_v29 }
 0x4e6   : > { %6075 = vpow2.f32 %v2817_v53 }
 0x4e7   : > { %6077 = vpow2.f32 %v2815_v55 }
 0x4f2   : > { %v6074_v31 = vpop.eup %6073 }
 0x4f3   : > { %v3390_v0 = vmul.f32 %v6074_v31, %v6906_v40 }
 0x4f5   : > { %v3394_v52 = vmul.f32 %v3392_v51, %v3390_v0 }
 0x4f7   : > { %v3907_v6 = vrot.slane %v3394_v52, %v6923_v16  ;;  %v7045_v16 = vpop.eup %6075 }
 0x4f8   : > { %v7052_v33 = vpop.eup %6077 }
 0x4f9   : > { %v3909_v48 = vmul.f32 %v3907_v6, %v6978_v49  ;;  %v3910_v43 = vmul.f32 %v3907_v6, %v6983_v50  ;;  %v7050_v50 = vld [vmem:[%s7361_s14] ss:$0 sm:$0xff] }
 0x4fa   : > { %v2834_v21 = vmul.f32 %v7045_v16, %v7050_v50  ;;  %v2833_v61 = vmul.f32 %v7052_v33, %v7050_v50 }
 0x4fb   : > { %3913 = vrot.lane.b32.xlu1 %v3909_v48, %s6159_s25 }
 0x4ff   : > { %3915 = vrot.lane.b32.xlu1 %v3910_v43, %s6159_s25 }
 0x524   : > { %v5809_v40 = vpop.f32.mrf.mxu1 }
 0x526   : > { %v2999_v49 = vpop.f32.mrf.mxu1 }
 0x528   : > { %v5819_v57 = vpop.f32.mrf.mxu1 }
 0x52a   : > { %v3160_v28 = vpop.f32.mrf.mxu1 }
 0x52c   : > { %v5804_v59 = vpop.f32.mrf.mxu0  ;;  %v5829_v58 = vpop.f32.mrf.mxu1 }
 0x52d   : > { %v2924_v56 = vadd.f32 %v5804_v59, %v2834_v21 }
 0x52e   : > { %v2913_v62 = vpop.f32.mrf.mxu0  ;;  %v3320_v3 = vpop.f32.mrf.mxu1 }
 0x52f   : > { %v2914_v63 = vadd.f32 %v2913_v62, %v2833_v61  ;;  %v3006_v1 = vadd.f32 %v5809_v40, %v2924_v56 }
 0x530   : > { %v5814_v4 = vpop.f32.mrf.mxu0  ;;  %v5839_v23 = vpop.f32.mrf.mxu1 }
 0x531   : > { %v3087_v5 = vadd.f32 %v5814_v4, %v3006_v1  ;;  %v3000_v54 = vadd.f32 %v2999_v49, %v2914_v63 }
 0x532   : > { %v3079_v7 = vpop.f32.mrf.mxu0  ;;  %v3568_v11 = vpop.f32.mrf.mxu1 }
 0x533   : > { %v3080_v8 = vadd.f32 %v3079_v7, %v3000_v54  ;;  %v3169_v9 = vadd.f32 %v5819_v57, %v3087_v5 }
 0x534   : > { %v5824_v14 = vpop.f32.mrf.mxu0  ;;  %v5849_v44 = vpop.f32.mrf.mxu1 }
 0x535   : > { %v3249_v20 = vadd.f32 %v5824_v14, %v3169_v9  ;;  %v3161_v34 = vadd.f32 %v3160_v28, %v3080_v8 }
 0x536   : > { %v3242_v35 = vpop.f32.mrf.mxu0  ;;  %v3729_v27 = vpop.f32.mrf.mxu1 }
 0x537   : > { %v7058_v37 = vadd.f32 %v5829_v58, %v3249_v20  ;;  %v3243_v2 = vadd.f32 %v3242_v35, %v3161_v34 }
 0x538   : > { %v5834_v39 = vpop.f32.mrf.mxu0  ;;  %v5859_v26 = vpop.f32.mrf.mxu1 }
 0x539   : > { %v7060_v38 = vadd.f32 %v3320_v3, %v3243_v2  ;;  %v3575_v30 = vadd.f32 %v5839_v23, %v5834_v39 }
 0x53a   : > { %v3482_v41 = vpop.f32.mrf.mxu0  ;;  %v3889_v24 = vpop.f32.mrf.mxu1 }
 0x53b   : > { %v3569_v12 = vadd.f32 %v3568_v11, %v3482_v41 }
 0x53c   : > { %v5844_v25 = vpop.f32.mrf.mxu0 }
 0x53d   : > { %v3656_v36 = vadd.f32 %v5844_v25, %v3575_v30 }
 0x53e   : > { %v3648_v32 = vpop.f32.mrf.mxu0 }
 0x53f   : > { %v3649_v18 = vadd.f32 %v3648_v32, %v3569_v12  ;;  %v3738_v47 = vadd.f32 %v5849_v44, %v3656_v36 }
 0x540   : > { %v5854_v19 = vpop.f32.mrf.mxu0 }
 0x541   : > { %v3730_v42 = vadd.f32 %v3729_v27, %v3649_v18  ;;  %v3818_v46 = vadd.f32 %v5854_v19, %v3738_v47 }
 0x542   : > { %v3811_v17 = vpop.f32.mrf.mxu0 }
 0x543   : > { %v3812_v13 = vadd.f32 %v3811_v17, %v3730_v42  ;;  %v3896_v31 = vadd.f32 %v5859_v26, %v3818_v46  ;;  %v4485_v46 = vld [vmem:[%s7356_s9 + $0x38] sm:$0xff] }
 0x545   : > { %v3890_v45 = vadd.f32 %v3889_v24, %v3812_v13  ;;  %v3900_v6 = vmul.f32 0.17677669, %v3896_v31  ;;  %v2819_v13 = vsel %vm2798_vm5, %v7017_v15, 0.0  ;;  %v2822_v24 = vsel %vm2798_vm5, %v7013_v10, 0.0  ;;  %v4482_v10 = vld [vmem:[%s7356_s9 + $0x20] sm:$0xff] }
 0x547   : > { %v3899_v51 = vmul.f32 0.17677669, %v3890_v45  ;;  %v3902_v55 = vadd.f32 %v3900_v6, %v6970_v22  ;;  %v4484_v45 = vld [vmem:[%s7356_s9 + $0x30] sm:$0xff] }
 0x548   : > { %v7099_v15 = vand.u32 4294901760, %v4484_v45 }
 0x549   : > { %v3901_v43 = vadd.f32 %v3899_v51, %v6970_v22  ;;  %v3930_v40 = vsel %vm2798_vm5, %v3902_v55, -inf  ;;  %v4481_v51 = vld [vmem:[%s7356_s9 + $0x18] sm:$0xff] }
 0x54b   : > { %v3927_v53 = vsel %vm2798_vm5, %v3901_v43, -inf }
 0x56d   : > { %v3914_v29 = vpop.permute.xlu1 %3913 }
 0x56e   : > { %v3919_v0 = vsel %vm2225_vm3, %v3914_v29, 0.0  ;;  %v7097_v29 = vand.u32 4294901760, %v4485_v46 }
 0x56f   : > { %3920 = vadd.xlane.f32.xlu1 %v3919_v0  ;;  %v7109_v0 = vand.u32 4294901760, %v4482_v10 }
 0x570   : > { %v7114_v6 = vsub.f32 %v4485_v46, %v7097_v29 }
 0x571   : > { %v3916_v52 = vpop.permute.xlu1 %3915 }
 0x572   : > { %v3922_v48 = vsel %vm2225_vm3, %v3916_v52, 0.0  ;;  %v7111_v52 = vand.u32 4294901760, %v4481_v51 }
 0x573   : > { %3923 = vadd.xlane.f32.xlu0 %v3922_v48  ;;  %v7117_v48 = vsub.f32 %v4484_v45, %v7099_v15 }
 0x577   : > { %3928 = vmax.xlane.f32.xlu0 %v3927_v53  ;;  %v7124_v53 = vsub.f32 %v4482_v10, %v7109_v0 }
 0x57b   : > { %3931 = vmax.xlane.f32.xlu0 %v3930_v40  ;;  %v7131_v40 = vand.u32 4294901760, %v7114_v6 }
 0x591   : > { %3958 = vrot.lane.b32.xlu0 %v6916_v60, %s6159_s25 }
 0x5f8   : > { %v3921_v49 = vpop.xlane.xlu1 %3920 }
 0x5f9   : > { %v3925_v57 = vmul.f32 0.17677669, %v3921_v49  ;;  %v7134_v49 = vand.u32 4294901760, %v7117_v48 }
 0x5fc   : > { %v3924_v21 = vpop.xlane.xlu0 %3923 }
 0x5fd   : > { %v3926_v61 = vmul.f32 0.17677669, %v3924_v21 }
 0x600   : > { %v3929_v59 = vpop.xlane.xlu0 %3928 }
 0x601   : > { %v3933_v56 = vmax.f32 %v3929_v59, %v3925_v57  ;;  %v4612_v59 = vsub.f32 %v7114_v6, %v7131_v40 }
 0x603   : > { %v3935_v62 = vsub.f32 %v3901_v43, %v3933_v56  ;;  %v3941_v34 = vsub.f32 %v3925_v57, %v3933_v56  ;;  %v7141_v57 = vand.u32 4294901760, %v7124_v53  ;;  %v4619_v56 = vsub.f32 %v7117_v48, %v7134_v49 }
 0x604   : > { %v3932_v63 = vpop.xlane.xlu0 %3931 }
 0x605   : > { %v3937_v1 = vmul.f32 1.442695, %v3935_v62  ;;  %v3934_v28 = vmax.f32 %v3932_v63, %v3926_v61  ;;  %v3943_v23 = vmul.f32 1.442695, %v3941_v34  ;;  %v4613_v63 = vand.u32 4294901760, %v4612_v59 }
 0x607   : > { %6079 = vpow2.f32 %v3937_v1  ;;  %v3936_v4 = vsub.f32 %v3902_v55, %v3934_v28  ;;  %v3942_v22 = vsub.f32 %v3926_v61, %v3934_v28  ;;  %v7127_v55 = vsub.f32 %v4481_v51, %v7111_v52 }
 0x608   : > { %v3959_v5 = vpop.permute.xlu0 %3958  ;;  %v4620_v1 = vand.u32 4294901760, %v4619_v56  ;;  %v4633_v28 = vsub.f32 %v7124_v53, %v7141_v57 }
 0x609   : > { %v3939_v54 = vmul.f32 1.442695, %v3936_v4  ;;  %v3945_v7 = vmul.f32 1.442695, %v3942_v22  ;;  %v4006_v8 = vand.u32 4294901760, %v3959_v5  ;;  %v7151_v62 = vand.u32 4294901760, %v7127_v55 }
 0x60b   : > { %6081 = vpow2.f32 %v3939_v54  ;;  %v4093_v9 = vsub.f32 %v3959_v5, %v4006_v8  ;;  %5860 = vmatprep.subr.mxu0 %v4006_v8  ;;  %v4640_v22 = vsub.f32 %v7127_v55, %v7151_v62  ;;  %v4634_v5 = vand.u32 4294901760, %v4633_v28 }
 0x60c   : > { %6083 = vpow2.f32 %v3945_v7  ;;  %5861 = vmatpush3.msra.mxu0 %v4006_v8 }
 0x60d   : > { %5870 = vmatprep.subr.mxu0 %v4093_v9  ;;  %v4094_v60 = vand.u32 4294901760, %v4093_v9  ;;  %6085 = vpow2.f32 %v3943_v23  ;;  %v4641_v54 = vand.u32 4294901760, %v4640_v22 }
 0x60f   : > { %v4095_v58 = vsub.f32 %v4093_v9, %v4094_v60 }
 0x611   : > { %v4096_v14 = vand.u32 4294901760, %v4095_v58 }
 0x613   : > { %5865 = vmatprep.subr.mxu1 %v4096_v14 }
 0x614   : > { %v6080_v20 = vpop.eup %6079  ;;  %5866 = vmatpush3.msra.mxu1 %v4096_v14 }
 0x615   : > { %5875 = vmatprep.subr.mxu1 %v4006_v8  ;;  %v3970_v35 = vsel %vm2798_vm5, %v6080_v20, 0  ;;  %v3947_v30 = vsel %vm2798_vm5, %v6080_v20, 0.0 }
 0x616   : > { %v4041_v2 = vand.u32 4294901760, %v3970_v35 }
 0x618   : > { %v6082_v3 = vpop.eup %6081  ;;  %5867 = vmatprep.mubr.f32.mxu1 %v4041_v2  ;;  %v4042_v39 = vsub.f32 %v3970_v35, %v4041_v2 }
 0x619   : > { %v7071_v41 = vpop.eup %6083  ;;  %v3950_v25 = vsel %vm2798_vm5, %v6082_v3, 0.0  ;;  %v3973_v11 = vsel %vm2798_vm5, %v6082_v3, 0 }
 0x61a   : > { %3951 = vadd.xlane.f32.xlu1 %v3950_v25  ;;  %v3956_v32 = vmul.f32 %v7071_v41, %v7050_v50  ;;  %v4051_v12 = vand.u32 4294901760, %v3973_v11  ;;  %v4043_v44 = vand.u32 4294901760, %v4042_v39  ;;  %v7079_v26 = vpop.eup %6085 }
 0x61b   : > { %v3955_v47 = vmul.f32 %v7079_v26, %v7050_v50  ;;  %v4483_v50 = vld [vmem:[%s7356_s9 + $0x28] sm:$0xff] }
 0x61c   : > { %3965 = vrot.lane.b32.xlu0 %v3956_v32, %s6159_s25  ;;  %v4052_v18 = vsub.f32 %v3973_v11, %v4051_v12  ;;  %5868 = vmatmul.mubr.f32.vlgmr.msra.gmra.mxu1 %v4051_v12  ;;  %v4044_v19 = vsub.f32 %v4042_v39, %v4043_v44  ;;  %v7101_v31 = vand.u32 4294901760, %v4483_v50 }
 0x61d   : > { %5876 = vmatpush3.msra.mxu1 %v4006_v8  ;;  %5877 = vmatprep.mubr.f32.mxu1 %v4043_v44  ;;  %v4478_v44 = vld [vmem:[%s7356_s9] sm:$0xff] }
 0x61e   : > { %5885 = vmatprep.subr.mxu1 %v4006_v8  ;;  %3948 = vadd.xlane.f32.xlu1 %v3947_v30  ;;  %v4045_v27 = vand.u32 4294901760, %v4044_v19  ;;  %v4053_v36 = vand.u32 4294901760, %v4052_v18  ;;  %v7120_v43 = vsub.f32 %v4483_v50, %v7101_v31 }
 0x620   : > { %5862 = vmatprep.mubr.f32.mxu0 %v4045_v27  ;;  %5878 = vmatmul.mubr.f32.vlgmr.msra.gmra.mxu1 %v4053_v36  ;;  %v4054_v42 = vsub.f32 %v4052_v18, %v4053_v36  ;;  %v7137_v21 = vand.u32 4294901760, %v7120_v43  ;;  %v7194_v27 = vand.u32 4294901760, %v4478_v44 }
 0x621   : > { %5886 = vmatpush3.msra.mxu1 %v4006_v8  ;;  %5887 = vmatprep.mubr.f32.mxu1 %v4041_v2 }
 0x622   : > { %v4055_v17 = vand.u32 4294901760, %v4054_v42  ;;  %v4626_v61 = vsub.f32 %v7120_v43, %v7137_v21  ;;  %5909 = vmatprep.subr.mxu1 %v4613_v63  ;;  %v7205_v46 = vsub.f32 %v4478_v44, %v7194_v27 }
 0x624   : > { %5863 = vmatmul.mubr.f32.vlgmr.msra.gmra.mxu0 %v4055_v17  ;;  %5888 = vmatmul.mubr.f32.vlgmr.msra.gmra.mxu1 %v4051_v12  ;;  %v4627_v4 = vand.u32 4294901760, %v4626_v61  ;;  %v7212_v56 = vand.u32 4294901760, %v7205_v46 }
 0x625   : > { %5871 = vmatpush3.msra.mxu0 %v4093_v9  ;;  %5872 = vmatprep.mubr.f32.mxu0 %v4042_v39 }
 0x626   : > { %5880 = vmatprep.subr.mxu0 %v4094_v60  ;;  %5910 = vmatpush3.msra.mxu1 %v4613_v63 }
 0x627   : > { %5911 = vmatprep.subr.mxu1 %v4620_v1 }
 0x628   : > { %5873 = vmatmul.mubr.f32.vlgmr.msra.gmra.mxu0 %v4052_v18  ;;  %5912 = vmatpush3.msra.mxu1 %v4620_v1 }
 0x629   : > { %5881 = vmatpush3.msra.mxu0 %v4094_v60  ;;  %5882 = vmatprep.mubr.f32.mxu0 %v4041_v2 }
 0x62a   : > { %5890 = vmatprep.subr.mxu0 %v7097_v29  ;;  %5913 = vmatprep.subr.mxu1 %v4627_v4 }
 0x62b   : > { %5914 = vmatpush3.msra.mxu1 %v4627_v4 }
 0x62c   : > { %5883 = vmatmul.mubr.f32.vlgmr.msra.gmra.mxu0 %v4051_v12  ;;  %5915 = vmatprep.subr.mxu1 %v4634_v5 }
 0x62d   : > { %5891 = vmatpush3.msra.mxu0 %v7097_v29  ;;  %5916 = vmatpush3.msra.mxu1 %v4634_v5  ;;  %v4661_v5 = vsub.f32 %v7205_v46, %v7212_v56 }
 0x62e   : > { %5892 = vmatprep.subr.mxu0 %v7099_v15  ;;  %5917 = vmatprep.subr.mxu1 %v4641_v54 }
 0x62f   : > { %3963 = vrot.lane.b32.xlu1 %v3955_v47, %s6159_s25  ;;  %5893 = vmatpush3.msra.mxu0 %v7099_v15 }
 0x630   : > { %5894 = vmatprep.subr.mxu0 %v7101_v31  ;;  %5918 = vmatpush3.msra.mxu1 %v4641_v54 }
 0x631   : > { %5895 = vmatpush3.msra.mxu0 %v7101_v31 }
 0x632   : > { %5896 = vmatprep.subr.mxu0 %v7109_v0 }
 0x633   : > { %5897 = vmatpush3.msra.mxu0 %v7109_v0 }
 0x634   : > { %5898 = vmatprep.subr.mxu0 %v7111_v52 }
 0x635   : > { %5899 = vmatpush3.msra.mxu0 %v7111_v52 }
 0x63b   : > { %2820 = vadd.xlane.f32.xlu0 %v2819_v13 }
 0x653   : > { %2823 = vadd.xlane.f32.xlu1 %v2822_v24 }
 0x68e   : > { %v3966_v7 = vpop.permute.xlu0 %3965 }
 0x6a3   : > { %v3952_v60 = vpop.xlane.xlu1 %3951 }
 0x6a4   : > { %v3954_v39 = vadd.f32 %v7071_v41, %v3952_v60  ;;  %v4662_v60 = vand.u32 4294901760, %v4661_v5 }
 0x6a7   : > { %v3949_v58 = vpop.xlane.xlu1 %3948 }
 0x6a8   : > { %v3953_v23 = vadd.f32 %v7079_v26, %v3949_v58 }
 0x6ab   : > { %v3964_v34 = vpop.permute.xlu1 %3963 }
 0x6c4   : > { %v2821_v8 = vpop.xlane.xlu0 %2820 }
 0x6c5   : > { %v2825_v9 = vadd.f32 %v7052_v33, %v2821_v8  ;;  %v4480_v33 = vld [vmem:[%s7356_s9 + $0x10] sm:$0xff] }
 0x6c6   : > { %v7173_v11 = vand.u32 4294901760, %v4480_v33 }
 0x6c7   : > { %6087 = vrcp.f32 %v2825_v9 }
 0x6c8   : > { %v7179_v32 = vsub.f32 %v4480_v33, %v7173_v11  ;;  %5900 = vmatprep.subr.mxu0 %v7173_v11 }
 0x6c9   : > { %5901 = vmatpush3.msra.mxu0 %v7173_v11 }
 0x6ca   : > { %v7189_v19 = vand.u32 4294901760, %v7179_v32 }
 0x6cc   : > { %v4647_v26 = vsub.f32 %v7179_v32, %v7189_v19 }
 0x6ce   : > { %v4648_v10 = vand.u32 4294901760, %v4647_v26 }
 0x6d0   : > { %5919 = vmatprep.subr.mxu1 %v4648_v10 }
 0x6d1   : > { %5920 = vmatpush3.msra.mxu1 %v4648_v10 }
 0x6d4   : > { %v6088_v14 = vpop.eup %6087 }
 0x6d5   : > { %v7165_v20 = vmul.f32 %v6088_v14, %v7060_v38  ;;  %v4479_v38 = vld [vmem:[%s7356_s9 + $0x8] sm:$0xff] }
 0x6dc   : > { %v5869_v35 = vpop.f32.mrf.mxu1  ;;  %v2824_v2 = vpop.xlane.xlu1 %2823 }
 0x6dd   : > { %v2826_v3 = vadd.f32 %v7045_v16, %v2824_v2  ;;  %v7181_v16 = vand.u32 4294901760, %v4479_v38 }
 0x6de   : > { %v4133_v25 = vpop.f32.mrf.mxu1 }
 0x6df   : > { %6089 = vrcp.f32 %v2826_v3  ;;  %v7192_v30 = vsub.f32 %v4479_v38, %v7181_v16  ;;  %5902 = vmatprep.subr.mxu0 %v7181_v16 }
 0x6e0   : > { %6091 = vrcp.f32 %v3954_v39  ;;  %v5879_v41 = vpop.f32.mrf.mxu1  ;;  %5903 = vmatpush3.msra.mxu0 %v7181_v16 }
 0x6e1   : > { %6093 = vrcp.f32 %v3953_v23  ;;  %v7201_v47 = vand.u32 4294901760, %v7192_v30  ;;  %5904 = vmatprep.subr.mxu0 %v7194_v27 }
 0x6e2   : > { %v4294_v13 = vpop.f32.mrf.mxu1  ;;  %5905 = vmatpush3.msra.mxu0 %v7194_v27 }
 0x6e3   : > { %v4654_v51 = vsub.f32 %v7192_v30, %v7201_v47  ;;  %5928 = vmatprep.subr.mxu0 %v7114_v6 }
 0x6e4   : > { %v5864_v12 = vpop.f32.mrf.mxu0  ;;  %v5889_v4 = vpop.f32.mrf.mxu1 }
 0x6e5   : > { %v4058_v18 = vadd.f32 %v5864_v12, %v3966_v7  ;;  %v4655_v1 = vand.u32 4294901760, %v4654_v51 }
 0x6e6   : > { %v4047_v36 = vpop.f32.mrf.mxu0 }
 0x6e7   : > { %v4048_v42 = vadd.f32 %v4047_v36, %v3964_v34  ;;  %v4140_v17 = vadd.f32 %v5869_v35, %v4058_v18  ;;  %5921 = vmatprep.subr.mxu1 %v4655_v1  ;;  %v4454_v35 = vpop.f32.mrf.mxu1 }
 0x6e8   : > { %v5874_v24 = vpop.f32.mrf.mxu0  ;;  %5922 = vmatpush3.msra.mxu1 %v4655_v1 }
 0x6e9   : > { %v4221_v45 = vadd.f32 %v5874_v24, %v4140_v17  ;;  %v4134_v50 = vadd.f32 %v4133_v25, %v4048_v42  ;;  %5923 = vmatprep.subr.mxu1 %v4662_v60 }
 0x6ea   : > { %v4213_v59 = vpop.f32.mrf.mxu0  ;;  %5924 = vmatpush3.msra.mxu1 %v4662_v60 }
 0x6eb   : > { %v4214_v61 = vadd.f32 %v4213_v59, %v4134_v50  ;;  %v4303_v63 = vadd.f32 %v5879_v41, %v4221_v45  ;;  %5947 = vmatprep.subr.mxu1 %v7097_v29 }
 0x6ec   : > { %v6090_v28 = vpop.eup %6089  ;;  %v5884_v22 = vpop.f32.mrf.mxu0 }
 0x6ed   : > { %v4383_v54 = vadd.f32 %v5884_v22, %v4303_v63  ;;  %v4295_v7 = vadd.f32 %v4294_v13, %v4214_v61  ;;  %v3333_v8 = vmul.f32 %v6090_v28, %v7058_v37  ;;  %v6092_v34 = vpop.eup %6091 }
 0x6ee   : > { %v4376_v9 = vpop.f32.mrf.mxu0  ;;  %v6094_v2 = vpop.eup %6093 }
 0x6ef   : > { %v4461_v58 = vadd.f32 %v5889_v4, %v4383_v54  ;;  %v4377_v14 = vadd.f32 %v4376_v9, %v4295_v7 }
 0x6f1   : > { %v4455_v3 = vadd.f32 %v4454_v35, %v4377_v14  ;;  %v4467_v39 = vmul.f32 %v6092_v34, %v4461_v58 }
 0x6f3   : > { %4472 = vrot.lane.b32.xlu1 %v4467_v39, %s6160_s24  ;;  %v4465_v23 = vmul.f32 %v6094_v2, %v4455_v3 }
 0x6f5   : > { %4470 = vrot.lane.b32.xlu0 %v4465_v23, %s6160_s24  ;;  %s7301_s24 = scalar_lea.hbm %s7362_s15, %s5199_s30  ;;  %s6099_s30 = sshll.u32 %s6161_s26, 4  ;;  %s6100_s30 = int_to_ptr.vmem [resolvable:$false] %s6099_s30 }
 0x6f6   : > { %s6101_s25 = scalar_lea.vmem %s6100_s30, 512  ;;  %p6102_p0 = scmp.lt.s32.totalorder %s7303_s27, %s6100_s30 }
 0x6f7   : > { %p6103_p1 = scmp.lt.s32.totalorder %s6101_s25, %s6095_s17 }
 0x6f9   : > { %p6104_p2 = por %p6103_p1, %p6102_p0 }
 0x6fb   : > { %p6105_p3 = pnand %p6104_p2, %p6098_p13 }
 0x765   : > { %v4473_v37 = vpop.permute.xlu1 %4472 }
 0x766   : > { %v4477_v25 = vsel %vm2225_vm3, %v3333_v8, %v4473_v37 }
 0x767   : > { %v4497_v33 = vsel %vm532_vm1, %v4477_v25, 0  ;;  %v4471_v38 = vpop.permute.xlu0 %4470 }
 0x768   : > { %v7222_v41 = vand.u32 4294901760, %v4497_v33  ;;  %v4476_v12 = vsel %vm2225_vm3, %v7165_v20, %v4471_v38 }
 0x769   : > { %v4494_v44 = vsel %vm532_vm1, %v4476_v12, 0 }
 0x76a   : > { %v4583_v18 = vsub.f32 %v4497_v33, %v7222_v41  ;;  %v4572_v36 = vand.u32 4294901760, %v4494_v44 }
 0x76c   : > { %v4584_v42 = vand.u32 4294901760, %v4583_v18  ;;  %v4573_v17 = vsub.f32 %v4494_v44, %v4572_v36  ;;  %5925 = vmatprep.mubr.f32.mxu1 %v4572_v36 }
 0x76d   : > { %5926 = vmatmul.mubr.f32.vlgmr.msra.gmra.mxu1 %v7222_v41 }
 0x76e   : > { %5948 = vmatpush3.msra.mxu1 %v7097_v29  ;;  %v4574_v26 = vand.u32 4294901760, %v4573_v17  ;;  %v4585_v13 = vsub.f32 %v4583_v18, %v4584_v42 }
 0x76f   : > { %5949 = vmatprep.subr.mxu1 %v7099_v15 }
 0x770   : > { %5950 = vmatpush3.msra.mxu1 %v7099_v15  ;;  %5963 = vmatprep.mubr.f32.mxu1 %v4574_v26  ;;  %v4575_v20 = vsub.f32 %v4573_v17, %v4574_v26  ;;  %v4586_v45 = vand.u32 4294901760, %v4585_v13 }
 0x771   : > { %5951 = vmatprep.subr.mxu1 %v7101_v31 }
 0x772   : > { %5952 = vmatpush3.msra.mxu1 %v7101_v31  ;;  %v4576_v24 = vand.u32 4294901760, %v4575_v20 }
 0x773   : > { %5953 = vmatprep.subr.mxu1 %v7109_v0 }
 0x774   : > { %5954 = vmatpush3.msra.mxu1 %v7109_v0  ;;  %5906 = vmatprep.mubr.f32.mxu0 %v4576_v24 }
 0x775   : > { %5955 = vmatprep.subr.mxu1 %v7111_v52  ;;  %5907 = vmatmul.mubr.f32.vlgmr.msra.gmra.mxu0 %v4586_v45 }
 0x776   : > { %5929 = vmatpush3.msra.mxu0 %v7114_v6  ;;  %5956 = vmatpush3.msra.mxu1 %v7111_v52 }
 0x777   : > { %5930 = vmatprep.subr.mxu0 %v7117_v48  ;;  %5944 = vmatprep.mubr.f32.mxu0 %v4573_v17 }
 0x778   : > { %5957 = vmatprep.subr.mxu1 %v7173_v11  ;;  %5931 = vmatpush3.msra.mxu0 %v7117_v48 }
 0x779   : > { %5958 = vmatpush3.msra.mxu1 %v7173_v11  ;;  %5932 = vmatprep.subr.mxu0 %v7120_v43 }
 0x77a   : > { %5959 = vmatprep.subr.mxu1 %v7181_v16  ;;  %5933 = vmatpush3.msra.mxu0 %v7120_v43 }
 0x77b   : > { %5960 = vmatpush3.msra.mxu1 %v7181_v16  ;;  %5934 = vmatprep.subr.mxu0 %v7124_v53 }
 0x77c   : > { %5961 = vmatprep.subr.mxu1 %v7194_v27  ;;  %5935 = vmatpush3.msra.mxu0 %v7124_v53 }
 0x77d   : > { %5962 = vmatpush3.msra.mxu1 %v7194_v27  ;;  %5936 = vmatprep.subr.mxu0 %v7127_v55 }
 0x77e   : > { %5964 = vmatmul.mubr.f32.vlgmr.msra.gmra.mxu1 %v4584_v42  ;;  %5985 = vmatprep.subr.mxu1 %v7097_v29 }
 0x77f   : > { %5937 = vmatpush3.msra.mxu0 %v7127_v55  ;;  %5986 = vmatpush3.msra.mxu1 %v7097_v29 }
 0x780   : > { %6001 = vmatprep.mubr.f32.mxu1 %v4572_v36  ;;  %5938 = vmatprep.subr.mxu0 %v7179_v32 }
 0x781   : > { %5987 = vmatprep.subr.mxu1 %v7099_v15  ;;  %5939 = vmatpush3.msra.mxu0 %v7179_v32 }
 0x782   : > { %5988 = vmatpush3.msra.mxu1 %v7099_v15  ;;  %5940 = vmatprep.subr.mxu0 %v7192_v30  ;;  %v5192_v15 = vld [vmem:[%s7357_s10] ss:$0 sm:$0xff] }
 0x783   : > { %5989 = vmatprep.subr.mxu1 %v7101_v31  ;;  %5941 = vmatpush3.msra.mxu0 %v7192_v30 }
 0x784   : > { %5990 = vmatpush3.msra.mxu1 %v7101_v31  ;;  %5942 = vmatprep.subr.mxu0 %v7205_v46 }
 0x785   : > { %5991 = vmatprep.subr.mxu1 %v7109_v0  ;;  %5943 = vmatpush3.msra.mxu0 %v7205_v46 }
 0x786   : > { %5992 = vmatpush3.msra.mxu1 %v7109_v0  ;;  %5945 = vmatmul.mubr.f32.vlgmr.msra.gmra.mxu0 %v4583_v18 }
 0x787   : > { %5966 = vmatprep.subr.mxu0 %v7131_v40  ;;  %5993 = vmatprep.subr.mxu1 %v7111_v52 }
 0x788   : > { %5967 = vmatpush3.msra.mxu0 %v7131_v40  ;;  %5982 = vmatprep.mubr.f32.mxu0 %v4572_v36 }
 0x789   : > { %5994 = vmatpush3.msra.mxu1 %v7111_v52  ;;  %5968 = vmatprep.subr.mxu0 %v7134_v49 }
 0x78a   : > { %5995 = vmatprep.subr.mxu1 %v7173_v11  ;;  %5969 = vmatpush3.msra.mxu0 %v7134_v49 }
 0x78b   : > { %5996 = vmatpush3.msra.mxu1 %v7173_v11  ;;  %5970 = vmatprep.subr.mxu0 %v7137_v21 }
 0x78c   : > { %5997 = vmatprep.subr.mxu1 %v7181_v16  ;;  %5971 = vmatpush3.msra.mxu0 %v7137_v21 }
 0x78d   : > { %5998 = vmatpush3.msra.mxu1 %v7181_v16  ;;  %5972 = vmatprep.subr.mxu0 %v7141_v57 }
 0x78e   : > { %5999 = vmatprep.subr.mxu1 %v7194_v27  ;;  %5973 = vmatpush3.msra.mxu0 %v7141_v57 }
 0x78f   : > { %6000 = vmatpush3.msra.mxu1 %v7194_v27  ;;  %5974 = vmatprep.subr.mxu0 %v7151_v62 }
 0x790   : > { %6002 = vmatmul.mubr.f32.vlgmr.msra.gmra.mxu1 %v7222_v41  ;;  %5975 = vmatpush3.msra.mxu0 %v7151_v62 }
 0x791   : > { %5976 = vmatprep.subr.mxu0 %v7189_v19 }
 0x792   : > { %5977 = vmatpush3.msra.mxu0 %v7189_v19 }
 0x793   : > { %5978 = vmatprep.subr.mxu0 %v7201_v47 }
 0x794   : > { %5979 = vmatpush3.msra.mxu0 %v7201_v47 }
 0x795   : > { %5980 = vmatprep.subr.mxu0 %v7212_v56 }
 0x796   : > { %5981 = vmatpush3.msra.mxu0 %v7212_v56 }
 0x797   : > { %5983 = vmatmul.mubr.f32.vlgmr.msra.gmra.mxu0 %v7222_v41 }
 0x82d   : > { %v5927_v31 = vpop.f32.mrf.mxu1 }
 0x82f   : > { %v4699_v43 = vpop.f32.mrf.mxu1 }
 0x835   : > { %v5908_v29 = vpop.f32.mrf.mxu0 }
 0x836   : > { %v4589_v52 = vadd.f32 %v5908_v29, %v5192_v15 }
 0x837   : > { %v4578_v0 = vpop.f32.mrf.mxu0 }
 0x838   : > { %v4579_v48 = vadd.f32 %v5192_v15, %v4578_v0  ;;  %v4706_v53 = vadd.f32 %v5927_v31, %v4589_v52 }
 0x83a   : > { %v4700_v21 = vadd.f32 %v4699_v43, %v4579_v48 }
 0x83e   : > { %v5965_v55 = vpop.f32.mrf.mxu1 }
 0x840   : > { %v4881_v62 = vpop.f32.mrf.mxu1 }
 0x846   : > { %v5946_v6 = vpop.f32.mrf.mxu0 }
 0x847   : > { %v4801_v49 = vadd.f32 %v5946_v6, %v4706_v53 }
 0x848   : > { %v4793_v40 = vpop.f32.mrf.mxu0 }
 0x849   : > { %v4794_v57 = vadd.f32 %v4793_v40, %v4700_v21  ;;  %v4890_v11 = vadd.f32 %v5965_v55, %v4801_v49 }
 0x84b   : > { %v4882_v30 = vadd.f32 %v4881_v62, %v4794_v57 }
 0x850   : > { %v6003_v32 = vpop.f32.mrf.mxu1 }
 0x852   : > { %v5069_v50 = vpop.f32.mrf.mxu1 }
 0x857   : > { %v5984_v16 = vpop.f32.mrf.mxu0 }
 0x858   : > { %v4991_v19 = vadd.f32 %v5984_v16, %v4890_v11 }
 0x859   : > { %v4984_v27 = vpop.f32.mrf.mxu0 }
 0x85a   : > { %v5076_v47 = vadd.f32 %v6003_v32, %v4991_v19  ;;  %v4985_v46 = vadd.f32 %v4984_v27, %v4882_v30 }
 0x85c   : > { %5080 = vst.msk [vmem:[%s511_s20 + $0x8] sm:$0xff] %vm532_vm1, %v5076_v47  ;;  %v5070_v10 = vadd.f32 %v5069_v50, %v4985_v46 }
 0x85e   : > { %5079 = vst.msk [vmem:[%s511_s20] sm:$0xff] %vm532_vm1, %v5070_v10 }
 0x85f   : > { %6108 = shalt.err (!%p6105_p3)
}
 0x860   : > { %s6109_s23 = scalar_lea.hbm %s7301_s24, 256  ;;  %s6113_s26 = scalar_lea.hbm %s7362_s15, 512 }
 0x861   : > { %p6110_p4 = scmp.ne.s32.totalorder %s7301_s24, %s6109_s23  ;;  %p6114_p9 = scmp.lt.s32.totalorder %s7301_s24, %s7362_s15 }
 0x862   : > { %p6115_p10 = scmp.lt.s32.totalorder %s6113_s26, %s6109_s23 }
 0x863   : > { %p6111_p7 = pnand %p6110_p4, %p6282_p5 }
 0x864   : > { %p6116_p11 = por %p6115_p10, %p6114_p9 }
 0x865   : > { %p6112_p8 = pneg %p6111_p7 }
 0x867   : > { %p6117_p12 = pnand %p6116_p11, %p6112_p8 }
 0x869   : > { %6120 = shalt.err (!%p6117_p12)
}
 0x86a   : > { %s6162_s17 = smov 128   ;;  %s6163_s30 = smov 8  }
 0x86b   : > { %6004 = dma.vmem_to_hbm [thread:$0]  (%p6282_p5), %s7303_s27, 256, %s7301_s24, %s7307_s22, %s6162_s17, %s6162_s17, %s6163_s30  }
 0x86c PF: > { %p6010_p13 = scmp.ge.s32.totalorder %s6155_s21, 2  ;;  %s5110_s25 = sand.u32 1, %s6143_s18  }
 0x86d   : > { %s5111_s0 = scalar_lea.sflag [#allocation3], %s5110_s25 }
 0x86e   : > { %p6007_p0 = pnand %p6010_p13, %p6286_p6 }
 0x870   : > { %p6008_p1 = pneg %p6007_p0 }
 0x872   : > { %6138 = dma.done.wait (%p6008_p1), %s5111_s0, 256  }
 0x873   : > { %6140 = vsyncadd (%p6008_p1), %s5111_s0, 4294967040  ;;  %s7375_s21 = sld [smem:[#allocation6_spill]]  ;;  %s7378_s18 = smov %s6147_s19 }
 0x874   : > { %s7376_s1 = sld [smem:[#allocation5_spill]] }
 0x875   : > { %s7377_s20 = sld [smem:[#allocation7_spill]] }
 0x879   : > { %p25_p2 = scmp.ge.s32.totalorder %s7375_s21, 4  }
 0x87a   : > { %s7379_s19 = smov %s7376_s1 }
 0x87b   :  { %27 = sbr.rel (!%p25_p2) target bundleno = 6 (0x6), region = 121 }
 0x880   :  { %5116 = vsyncpa [#allocation3], 1 }
 0x881   :  { %5118 = vsyncpa [#allocation3 + $0x1], 1 }

</bundles_post_ra>
